<compile_context>
chip_gen: v5e
topology: v5e:2x2
jax: 0.10.0
libtpu: 0.0.40
codegen_flags: <defaults>
</compile_context>

<pallas_src>
import functools
import math

import jax
import jax.numpy as jnp
from jax.experimental import pallas as pl
from jax.experimental.pallas import tpu as pltpu

# ----------------------------- small config ---------------------------------
VOCAB_SIZE = 65
N_EMBD = 32
N_HEADS = 4
N_LAYERS = 2
BLOCK_SIZE = 16   # max context (position table rows)
BATCH = 2
SEQ = 8           # T <= BLOCK_SIZE
LN_EPS = 1e-5
VOCAB_PAD = 128   # lane-dense lm_head output width (zero padded)

# row layout of the packed small-vector buffer (per layer)
_V_LN1W, _V_LN1B, _V_BO, _V_LN2W, _V_LN2B, _V_B2, _V_B1 = range(7)
# final slot rows
_V_LNFW, _V_LNFB, _V_LMB = 0, 1, 2


# ------------------------------ kernel body ----------------------------------
def _layer_norm(x, w, b):
    mu = jnp.mean(x, axis=-1, keepdims=True)
    var = jnp.mean((x - mu) * (x - mu), axis=-1, keepdims=True)
    return (x - mu) * jax.lax.rsqrt(var + LN_EPS) * w + b


def gpt_fused_kernel(x_ref, wqkv_ref, wo_ref, w1_ref, w2_ref, vec_ref, lm_w_ref,
                     o_ref, *, n_layers, n_heads):
    x = x_ref[...].astype(jnp.float32)               # (T, C): one batch's rows
    rows, C = x.shape
    hs = C // n_heads

    # Additive causal mask: 0 on/below the diagonal, -1e30 above.
    r = jax.lax.broadcasted_iota(jnp.int32, (rows, rows), 0)
    c = jax.lax.broadcasted_iota(jnp.int32, (rows, rows), 1)
    mask_add = jnp.where(r >= c, 0.0, -1e30).astype(jnp.float32)

    for l in range(n_layers):                         # static unroll, L small
        lv = vec_ref[l]                               # (8, W) packed vectors
        ln1_w = lv[_V_LN1W:_V_LN1W + 1, :C]
        ln1_b = lv[_V_LN1B:_V_LN1B + 1, :C]
        bo    = lv[_V_BO:_V_BO + 1, :C]
        ln2_w = lv[_V_LN2W:_V_LN2W + 1, :C]
        ln2_b = lv[_V_LN2B:_V_LN2B + 1, :C]
        b2    = lv[_V_B2:_V_B2 + 1, :C]
        b1    = lv[_V_B1:_V_B1 + 1, :4 * C]

        # --- self-attention branch (pre-LN) ---
        h = _layer_norm(x, ln1_w, ln1_b)
        # Fused QKV projection: one (rows, C) x (C, 3C) matmul.
        # Attention scale (hs**-0.5) is pre-folded into the Wq columns.
        qkv = jnp.dot(h, wqkv_ref[l], preferred_element_type=jnp.float32)
        heads = []
        for hd in range(n_heads):                     # static unroll, H small
            lo = hd * hs
            q = qkv[:, lo:lo + hs]
            k = qkv[:, C + lo:C + lo + hs]
            v = qkv[:, 2 * C + lo:2 * C + lo + hs]
            s = jax.lax.dot_general(q, k, (((1,), (1,)), ((), ())),
                                    preferred_element_type=jnp.float32)
            s = s + mask_add
            s = s - jnp.max(s, axis=-1, keepdims=True)
            p = jnp.exp(s)
            p = p * pl.reciprocal(jnp.sum(p, axis=-1, keepdims=True), approx=True)
            heads.append(jnp.dot(p, v, preferred_element_type=jnp.float32))
        # Head concat along lanes -> one lane-dense (C-wide) output projection.
        o_all = jnp.concatenate(heads, axis=-1)       # (rows, C)
        x = x + jnp.dot(o_all, wo_ref[l],
                        preferred_element_type=jnp.float32) + bo

        # --- feed-forward branch (pre-LN) ---
        h2 = _layer_norm(x, ln2_w, ln2_b)
        ff = jnp.dot(h2, w1_ref[l], preferred_element_type=jnp.float32) + b1
        ff = jnp.maximum(ff, 0.0)                     # ReLU
        x = x + jnp.dot(ff, w2_ref[l], preferred_element_type=jnp.float32) + b2

    # --- final LN + lm_head (lane-dense padded output, unmasked vst) ---
    fv = vec_ref[n_layers]
    lnf_w = fv[_V_LNFW:_V_LNFW + 1, :C]
    lnf_b = fv[_V_LNFB:_V_LNFB + 1, :C]
    lm_b  = fv[_V_LMB:_V_LMB + 1, :o_ref.shape[-1]]
    hf = _layer_norm(x, lnf_w, lnf_b)
    o_ref[...] = (jnp.dot(hf, lm_w_ref[...], preferred_element_type=jnp.float32)
                  + lm_b).astype(o_ref.dtype)


# ------------------------------ pallas wrapper --------------------------------
def run_gpt(x2d, kp, *, batch, seq_len):
    """x2d: (B*T, C) activations -> (B*T, VOCAB_PAD) logits (zero-padded)."""
    bt, C = x2d.shape
    assert bt == batch * seq_len
    n_layers = kp["wqkv"].shape[0]
    vpad = kp["lm_w"].shape[1]

    kernel = functools.partial(gpt_fused_kernel, n_layers=n_layers,
                               n_heads=N_HEADS)

    def resident(shape):
        # Constant block index -> fetched once, stays VMEM-resident across
        # grid steps (no per-step weight re-DMA).
        return pl.BlockSpec(shape, lambda b, _r=len(shape): (0,) * _r)

    return pl.pallas_call(
        kernel,
        out_shape=jax.ShapeDtypeStruct((bt, vpad), jnp.float32),
        grid=(batch,),                                 # one batch per step
        in_specs=[
            pl.BlockSpec((seq_len, C), lambda b: (b, 0)),   # activations
            resident(kp["wqkv"].shape),
            resident(kp["wo"].shape),
            resident(kp["w1"].shape),
            resident(kp["w2"].shape),
            resident(kp["vec"].shape),
            resident(kp["lm_w"].shape),
        ],
        out_specs=pl.BlockSpec((seq_len, vpad), lambda b: (b, 0)),
        compiler_params=pltpu.CompilerParams(dimension_semantics=("parallel",)),
    )(x2d, kp["wqkv"], kp["wo"], kp["w1"], kp["w2"], kp["vec"], kp["lm_w"])


# -------------------------- parameter preparation -----------------------------
def prep_kernel_params(params):
    """Reference-layout params -> kernel layout:
       * wq/wk/wv concatenated to (L, C, 3C), scale folded into the wq block;
       * all small (1,C)/(1,4C) vectors packed into one (L+1, 8, W) buffer;
       * lm_head padded to a lane-dense 128-wide output."""
    C, nh = N_EMBD, N_HEADS
    hs = C // nh
    scale = hs ** -0.5
    blocks = params["blocks"]
    L = len(blocks)
    W = max(4 * C, VOCAB_PAD)

    wqkv = jnp.stack([jnp.concatenate([b["wq"] * scale, b["wk"], b["wv"]],
                                      axis=-1) for b in blocks])      # (L,C,3C)
    wo = jnp.stack([b["wo"] for b in blocks])                         # (L,C,C)
    w1 = jnp.stack([b["w1"] for b in blocks])                         # (L,C,4C)
    w2 = jnp.stack([b["w2"] for b in blocks])                         # (L,4C,C)

    vec = jnp.zeros((L + 1, 8, W), jnp.float32)
    for l, b in enumerate(blocks):
        vec = vec.at[l, _V_LN1W, :C].set(b["ln1_w"][0])
        vec = vec.at[l, _V_LN1B, :C].set(b["ln1_b"][0])
        vec = vec.at[l, _V_BO,   :C].set(b["bo"][0])
        vec = vec.at[l, _V_LN2W, :C].set(b["ln2_w"][0])
        vec = vec.at[l, _V_LN2B, :C].set(b["ln2_b"][0])
        vec = vec.at[l, _V_B2,   :C].set(b["b2"][0])
        vec = vec.at[l, _V_B1, :4 * C].set(b["b1"][0])

    f = params["final"]
    V = f["lm_w"].shape[1]
    vec = vec.at[L, _V_LNFW, :C].set(f["lnf_w"][0])
    vec = vec.at[L, _V_LNFB, :C].set(f["lnf_b"][0])
    vec = vec.at[L, _V_LMB, :V].set(f["lm_b"][0])

    lm_w = jnp.zeros((C, VOCAB_PAD), jnp.float32).at[:, :V].set(f["lm_w"])
    return {"wqkv": wqkv, "wo": wo, "w1": w1, "w2": w2, "vec": vec, "lm_w": lm_w}


def gpt_forward(idx, params):
    """idx: (B, T) int32 tokens -> logits (B, T, vocab). Loss path omitted."""
    kp = prep_kernel_params(params)          # one-time host-side transform
    B, T = idx.shape
    tok_emb = params["token_table"][idx]     # (B, T, C) glue gather
    pos_emb = params["pos_table"][:T]        # (T, C)
    x = (tok_emb + pos_emb[None, :, :]).reshape(B * T, N_EMBD)
    logits_pad = run_gpt(x, kp, batch=B, seq_len=T)   # (B*T, VOCAB_PAD)
    return logits_pad.reshape(B, T, VOCAB_PAD)[:, :, :VOCAB_SIZE]


# ------------------------------ parameter init --------------------------------
def init_params(key):
    keys = iter(jax.random.split(key, 64))

    def normal(shape, std=0.02):
        return jax.random.normal(next(keys), shape, jnp.float32) * std

    C, F, V = N_EMBD, 4 * N_EMBD, VOCAB_SIZE
    params = {
        "token_table": normal((V, C)),
        "pos_table": normal((BLOCK_SIZE, C)),
        "blocks": [],
        "final": {
            "lnf_w": jnp.ones((1, C), jnp.float32),
            "lnf_b": jnp.zeros((1, C), jnp.float32),
            "lm_w": normal((C, V)),                  # (in, out) layout
            "lm_b": jnp.zeros((1, V), jnp.float32),
        },
    }
    for _ in range(N_LAYERS):
        params["blocks"].append({
            "ln1_w": jnp.ones((1, C), jnp.float32),
            "ln1_b": jnp.zeros((1, C), jnp.float32),
            "wq": normal((C, C)), "wk": normal((C, C)), "wv": normal((C, C)),
            "wo": normal((C, C)), "bo": jnp.zeros((1, C), jnp.float32),
            "ln2_w": jnp.ones((1, C), jnp.float32),
            "ln2_b": jnp.zeros((1, C), jnp.float32),
            "w1": normal((C, F)), "b1": jnp.zeros((1, F), jnp.float32),
            "w2": normal((F, C)), "b2": jnp.zeros((1, C), jnp.float32),
        })
    return params


# ------------------------------ pure-JAX reference ----------------------------
def _ln_ref(x, w, b):
    mu = jnp.mean(x, -1, keepdims=True)
    var = jnp.mean((x - mu) ** 2, -1, keepdims=True)
    return (x - mu) / jnp.sqrt(var + LN_EPS) * w + b


def gpt_ref(idx, params):
    hi = jax.lax.Precision.HIGHEST
    B, T = idx.shape
    C = N_EMBD
    hs = C // N_HEADS
    x = params["token_table"][idx] + params["pos_table"][:T][None]
    mask = jnp.tril(jnp.ones((T, T), bool))
    for p in params["blocks"]:
        h = _ln_ref(x, p["ln1_w"], p["ln1_b"])
        q = jnp.einsum("btc,cd->btd", h, p["wq"], precision=hi)
        k = jnp.einsum("btc,cd->btd", h, p["wk"], precision=hi)
        v = jnp.einsum("btc,cd->btd", h, p["wv"], precision=hi)
        q = q.reshape(B, T, N_HEADS, hs)
        k = k.reshape(B, T, N_HEADS, hs)
        v = v.reshape(B, T, N_HEADS, hs)
        wei = jnp.einsum("bqhd,bkhd->bhqk", q, k, precision=hi) * hs ** -0.5
        wei = jnp.where(mask[None, None], wei, -jnp.inf)
        wei = jax.nn.softmax(wei, axis=-1)
        att = jnp.einsum("bhqk,bkhd->bqhd", wei, v, precision=hi).reshape(B, T, C)
        x = x + jnp.einsum("btc,cd->btd", att, p["wo"], precision=hi) + p["bo"]
        h2 = _ln_ref(x, p["ln2_w"], p["ln2_b"])
        ff = jax.nn.relu(jnp.einsum("btc,cf->btf", h2, p["w1"], precision=hi) + p["b1"])
        x = x + jnp.einsum("btf,fc->btc", ff, p["w2"], precision=hi) + p["b2"]
    fp = params["final"]
    h = _ln_ref(x, fp["lnf_w"], fp["lnf_b"])
    return jnp.einsum("btc,cv->btv", h, fp["lm_w"], precision=hi) + fp["lm_b"]


# ------------------------------------ main -------------------------------------
if __name__ == "__main__":
    key = jax.random.PRNGKey(0)
    pkey, ikey = jax.random.split(key)
    params = init_params(pkey)
    idx = jax.random.randint(ikey, (BATCH, SEQ), 0, VOCAB_SIZE, dtype=jnp.int32)

    logits = gpt_forward(idx, params)
    logits = jax.block_until_ready(logits)
    assert logits.shape == (BATCH, SEQ, VOCAB_SIZE), logits.shape

    ref = jax.block_until_ready(gpt_ref(idx, params))
    err = float(jnp.max(jnp.abs(logits - ref)))
    if not math.isfinite(err) or err > 1e-3:
        raise SystemExit(f"mismatch vs reference: max abs err = {err}")

    print("KERNEL_OK")
</pallas_src>

<mosaic_0001>
module attributes {stable_mosaic.version = 11 : i64} {
  func.func @gpt_fused_kernel(%arg0: i32, %arg1: memref<8x32xf32, #tpu.memory_space<vmem>>, %arg2: memref<2x32x96xf32, #tpu.memory_space<vmem>>, %arg3: memref<2x32x32xf32, #tpu.memory_space<vmem>>, %arg4: memref<2x32x128xf32, #tpu.memory_space<vmem>>, %arg5: memref<2x128x32xf32, #tpu.memory_space<vmem>>, %arg6: memref<3x8x128xf32, #tpu.memory_space<vmem>>, %arg7: memref<32x128xf32, #tpu.memory_space<vmem>>, %arg8: memref<8x128xf32, #tpu.memory_space<vmem>>) attributes {dimension_semantics = [#tpu.dimension_semantics<parallel>], iteration_bounds = array<i64: 2>, scalar_prefetch = 0 : i64, scratch_operands = 0 : i64, tpu.core_type = #tpu.core_type<tc>, window_params = [{transform_indices = @transform_0, window_bounds = array<i64: 8, 32>}, {pipeline_mode = #tpu.pipeline_mode<synchronous>, transform_indices = @transform_1, window_bounds = array<i64: 2, 32, 96>}, {pipeline_mode = #tpu.pipeline_mode<synchronous>, transform_indices = @transform_2, window_bounds = array<i64: 2, 32, 32>}, {pipeline_mode = #tpu.pipeline_mode<synchronous>, transform_indices = @transform_3, window_bounds = array<i64: 2, 32, 128>}, {pipeline_mode = #tpu.pipeline_mode<synchronous>, transform_indices = @transform_4, window_bounds = array<i64: 2, 128, 32>}, {pipeline_mode = #tpu.pipeline_mode<synchronous>, transform_indices = @transform_5, window_bounds = array<i64: 3, 8, 128>}, {pipeline_mode = #tpu.pipeline_mode<synchronous>, transform_indices = @transform_6, window_bounds = array<i64: 32, 128>}, {transform_indices = @transform_7, window_bounds = array<i64: 8, 128>}]} {
    %c0 = arith.constant 0 : index
    %c0_0 = arith.constant 0 : index
    %0 = vector.load %arg1[%c0, %c0_0] : memref<8x32xf32, #tpu.memory_space<vmem>>, vector<8x32xf32>
    %1 = tpu.iota {dimensions = array<i32: 0>} : vector<8x8xi32>
    %2 = tpu.iota {dimensions = array<i32: 1>} : vector<8x8xi32>
    %3 = arith.cmpi sge, %1, %2 : vector<8x8xi32>
    %cst = arith.constant 0.000000e+00 : f32
    %cst_1 = arith.constant -1.000000e+30 : f32
    %4 = vector.broadcast %cst : f32 to vector<8x8xf32>
    %5 = vector.broadcast %cst_1 : f32 to vector<8x8xf32>
    %6 = arith.select %3, %4, %5 : vector<8x8xi1>, vector<8x8xf32>
    %c0_2 = arith.constant 0 : index
    %c0_3 = arith.constant 0 : index
    %c0_4 = arith.constant 0 : index
    %7 = vector.load %arg6[%c0_2, %c0_3, %c0_4] : memref<3x8x128xf32, #tpu.memory_space<vmem>>, vector<1x8x128xf32>
    %8 = vector.shape_cast %7 : vector<1x8x128xf32> to vector<8x128xf32>
    %9 = vector.extract_strided_slice %8 {offsets = [0, 0], sizes = [1, 32], strides = [1, 1]} : vector<8x128xf32> to vector<1x32xf32>
    %10 = vector.extract_strided_slice %8 {offsets = [1, 0], sizes = [1, 32], strides = [1, 1]} : vector<8x128xf32> to vector<1x32xf32>
    %11 = vector.extract_strided_slice %8 {offsets = [2, 0], sizes = [1, 32], strides = [1, 1]} : vector<8x128xf32> to vector<1x32xf32>
    %12 = vector.extract_strided_slice %8 {offsets = [3, 0], sizes = [1, 32], strides = [1, 1]} : vector<8x128xf32> to vector<1x32xf32>
    %13 = vector.extract_strided_slice %8 {offsets = [4, 0], sizes = [1, 32], strides = [1, 1]} : vector<8x128xf32> to vector<1x32xf32>
    %14 = vector.extract_strided_slice %8 {offsets = [5, 0], sizes = [1, 32], strides = [1, 1]} : vector<8x128xf32> to vector<1x32xf32>
    %15 = vector.extract_strided_slice %8 {offsets = [6, 0], sizes = [1, 128], strides = [1, 1]} : vector<8x128xf32> to vector<1x128xf32>
    %cst_5 = arith.constant dense<0.000000e+00> : vector<8xf32>
    %16 = vector.multi_reduction <add>, %0, %cst_5 [1] : vector<8x32xf32> to vector<8xf32>
    %17 = vector.shape_cast %16 : vector<8xf32> to vector<8x1xf32>
    %cst_6 = arith.constant 3.200000e+01 : f32
    %18 = vector.broadcast %cst_6 : f32 to vector<8x1xf32>
    %19 = arith.divf %17, %18 : vector<8x1xf32>
    %20 = vector.broadcast %19 : vector<8x1xf32> to vector<8x32xf32>
    %21 = arith.subf %0, %20 : vector<8x32xf32>
    %22 = vector.broadcast %19 : vector<8x1xf32> to vector<8x32xf32>
    %23 = arith.subf %0, %22 : vector<8x32xf32>
    %24 = arith.mulf %21, %23 : vector<8x32xf32>
    %cst_7 = arith.constant dense<0.000000e+00> : vector<8xf32>
    %25 = vector.multi_reduction <add>, %24, %cst_7 [1] : vector<8x32xf32> to vector<8xf32>
    %26 = vector.shape_cast %25 : vector<8xf32> to vector<8x1xf32>
    %cst_8 = arith.constant 3.200000e+01 : f32
    %27 = vector.broadcast %cst_8 : f32 to vector<8x1xf32>
    %28 = arith.divf %26, %27 : vector<8x1xf32>
    %29 = vector.broadcast %19 : vector<8x1xf32> to vector<8x32xf32>
    %30 = arith.subf %0, %29 : vector<8x32xf32>
    %cst_9 = arith.constant 9.99999974E-6 : f32
    %31 = vector.broadcast %cst_9 : f32 to vector<8x1xf32>
    %32 = arith.addf %28, %31 : vector<8x1xf32>
    %33 = math.rsqrt %32 : vector<8x1xf32>
    %34 = vector.broadcast %33 : vector<8x1xf32> to vector<8x32xf32>
    %35 = arith.mulf %30, %34 : vector<8x32xf32>
    %36 = vector.broadcast %9 : vector<1x32xf32> to vector<8x32xf32>
    %37 = arith.mulf %35, %36 : vector<8x32xf32>
    %38 = vector.broadcast %10 : vector<1x32xf32> to vector<8x32xf32>
    %39 = arith.addf %37, %38 : vector<8x32xf32>
    %c0_10 = arith.constant 0 : index
    %c0_11 = arith.constant 0 : index
    %c0_12 = arith.constant 0 : index
    %40 = vector.load %arg2[%c0_10, %c0_11, %c0_12] : memref<2x32x96xf32, #tpu.memory_space<vmem>>, vector<1x32x96xf32>
    %41 = vector.shape_cast %40 : vector<1x32x96xf32> to vector<32x96xf32>
    %cst_13 = arith.constant dense<0.000000e+00> : vector<8x96xf32>
    %42 = tpu.matmul %39, %41, %cst_13 {dimension_numbers = #tpu.dot_dimension_numbers<[1], [0], [0], [1], [0, 0, 1, 1], [], []>} : vector<8x32xf32>, vector<32x96xf32>, vector<8x96xf32> -> vector<8x96xf32>
    %43 = vector.extract_strided_slice %42 {offsets = [0, 0], sizes = [8, 8], strides = [1, 1]} : vector<8x96xf32> to vector<8x8xf32>
    %44 = vector.extract_strided_slice %42 {offsets = [0, 32], sizes = [8, 8], strides = [1, 1]} : vector<8x96xf32> to vector<8x8xf32>
    %45 = vector.extract_strided_slice %42 {offsets = [0, 64], sizes = [8, 8], strides = [1, 1]} : vector<8x96xf32> to vector<8x8xf32>
    %cst_14 = arith.constant dense<0.000000e+00> : vector<8x8xf32>
    %46 = tpu.matmul %43, %44, %cst_14 {dimension_numbers = #tpu.dot_dimension_numbers<[1], [1], [0], [0], [0, 0, 1, 0], [], []>} : vector<8x8xf32>, vector<8x8xf32>, vector<8x8xf32> -> vector<8x8xf32>
    %47 = arith.addf %46, %6 : vector<8x8xf32>
    %cst_15 = arith.constant dense<0xFF800000> : vector<8xf32>
    %48 = vector.multi_reduction <maximumf>, %47, %cst_15 [1] : vector<8x8xf32> to vector<8xf32>
    %49 = vector.shape_cast %48 : vector<8xf32> to vector<8x1xf32>
    %50 = vector.broadcast %49 : vector<8x1xf32> to vector<8x8xf32>
    %51 = arith.subf %47, %50 : vector<8x8xf32>
    %52 = math.exp %51 : vector<8x8xf32>
    %cst_16 = arith.constant dense<0.000000e+00> : vector<8xf32>
    %53 = vector.multi_reduction <add>, %52, %cst_16 [1] : vector<8x8xf32> to vector<8xf32>
    %54 = vector.shape_cast %53 : vector<8xf32> to vector<8x1xf32>
    %55 = tpu.reciprocal %54 {approx = true} : vector<8x1xf32> -> vector<8x1xf32>
    %56 = vector.broadcast %55 : vector<8x1xf32> to vector<8x8xf32>
    %57 = arith.mulf %52, %56 : vector<8x8xf32>
    %cst_17 = arith.constant dense<0.000000e+00> : vector<8x8xf32>
    %58 = tpu.matmul %57, %45, %cst_17 {dimension_numbers = #tpu.dot_dimension_numbers<[1], [0], [0], [1], [0, 0, 1, 1], [], []>} : vector<8x8xf32>, vector<8x8xf32>, vector<8x8xf32> -> vector<8x8xf32>
    %59 = vector.extract_strided_slice %42 {offsets = [0, 8], sizes = [8, 8], strides = [1, 1]} : vector<8x96xf32> to vector<8x8xf32>
    %60 = vector.extract_strided_slice %42 {offsets = [0, 40], sizes = [8, 8], strides = [1, 1]} : vector<8x96xf32> to vector<8x8xf32>
    %61 = vector.extract_strided_slice %42 {offsets = [0, 72], sizes = [8, 8], strides = [1, 1]} : vector<8x96xf32> to vector<8x8xf32>
    %cst_18 = arith.constant dense<0.000000e+00> : vector<8x8xf32>
    %62 = tpu.matmul %59, %60, %cst_18 {dimension_numbers = #tpu.dot_dimension_numbers<[1], [1], [0], [0], [0, 0, 1, 0], [], []>} : vector<8x8xf32>, vector<8x8xf32>, vector<8x8xf32> -> vector<8x8xf32>
    %63 = arith.addf %62, %6 : vector<8x8xf32>
    %cst_19 = arith.constant dense<0xFF800000> : vector<8xf32>
    %64 = vector.multi_reduction <maximumf>, %63, %cst_19 [1] : vector<8x8xf32> to vector<8xf32>
    %65 = vector.shape_cast %64 : vector<8xf32> to vector<8x1xf32>
    %66 = vector.broadcast %65 : vector<8x1xf32> to vector<8x8xf32>
    %67 = arith.subf %63, %66 : vector<8x8xf32>
    %68 = math.exp %67 : vector<8x8xf32>
    %cst_20 = arith.constant dense<0.000000e+00> : vector<8xf32>
    %69 = vector.multi_reduction <add>, %68, %cst_20 [1] : vector<8x8xf32> to vector<8xf32>
    %70 = vector.shape_cast %69 : vector<8xf32> to vector<8x1xf32>
    %71 = tpu.reciprocal %70 {approx = true} : vector<8x1xf32> -> vector<8x1xf32>
    %72 = vector.broadcast %71 : vector<8x1xf32> to vector<8x8xf32>
    %73 = arith.mulf %68, %72 : vector<8x8xf32>
    %cst_21 = arith.constant dense<0.000000e+00> : vector<8x8xf32>
    %74 = tpu.matmul %73, %61, %cst_21 {dimension_numbers = #tpu.dot_dimension_numbers<[1], [0], [0], [1], [0, 0, 1, 1], [], []>} : vector<8x8xf32>, vector<8x8xf32>, vector<8x8xf32> -> vector<8x8xf32>
    %75 = vector.extract_strided_slice %42 {offsets = [0, 16], sizes = [8, 8], strides = [1, 1]} : vector<8x96xf32> to vector<8x8xf32>
    %76 = vector.extract_strided_slice %42 {offsets = [0, 48], sizes = [8, 8], strides = [1, 1]} : vector<8x96xf32> to vector<8x8xf32>
    %77 = vector.extract_strided_slice %42 {offsets = [0, 80], sizes = [8, 8], strides = [1, 1]} : vector<8x96xf32> to vector<8x8xf32>
    %cst_22 = arith.constant dense<0.000000e+00> : vector<8x8xf32>
    %78 = tpu.matmul %75, %76, %cst_22 {dimension_numbers = #tpu.dot_dimension_numbers<[1], [1], [0], [0], [0, 0, 1, 0], [], []>} : vector<8x8xf32>, vector<8x8xf32>, vector<8x8xf32> -> vector<8x8xf32>
    %79 = arith.addf %78, %6 : vector<8x8xf32>
    %cst_23 = arith.constant dense<0xFF800000> : vector<8xf32>
    %80 = vector.multi_reduction <maximumf>, %79, %cst_23 [1] : vector<8x8xf32> to vector<8xf32>
    %81 = vector.shape_cast %80 : vector<8xf32> to vector<8x1xf32>
    %82 = vector.broadcast %81 : vector<8x1xf32> to vector<8x8xf32>
    %83 = arith.subf %79, %82 : vector<8x8xf32>
    %84 = math.exp %83 : vector<8x8xf32>
    %cst_24 = arith.constant dense<0.000000e+00> : vector<8xf32>
    %85 = vector.multi_reduction <add>, %84, %cst_24 [1] : vector<8x8xf32> to vector<8xf32>
    %86 = vector.shape_cast %85 : vector<8xf32> to vector<8x1xf32>
    %87 = tpu.reciprocal %86 {approx = true} : vector<8x1xf32> -> vector<8x1xf32>
    %88 = vector.broadcast %87 : vector<8x1xf32> to vector<8x8xf32>
    %89 = arith.mulf %84, %88 : vector<8x8xf32>
    %cst_25 = arith.constant dense<0.000000e+00> : vector<8x8xf32>
    %90 = tpu.matmul %89, %77, %cst_25 {dimension_numbers = #tpu.dot_dimension_numbers<[1], [0], [0], [1], [0, 0, 1, 1], [], []>} : vector<8x8xf32>, vector<8x8xf32>, vector<8x8xf32> -> vector<8x8xf32>
    %91 = vector.extract_strided_slice %42 {offsets = [0, 24], sizes = [8, 8], strides = [1, 1]} : vector<8x96xf32> to vector<8x8xf32>
    %92 = vector.extract_strided_slice %42 {offsets = [0, 56], sizes = [8, 8], strides = [1, 1]} : vector<8x96xf32> to vector<8x8xf32>
    %93 = vector.extract_strided_slice %42 {offsets = [0, 88], sizes = [8, 8], strides = [1, 1]} : vector<8x96xf32> to vector<8x8xf32>
    %cst_26 = arith.constant dense<0.000000e+00> : vector<8x8xf32>
    %94 = tpu.matmul %91, %92, %cst_26 {dimension_numbers = #tpu.dot_dimension_numbers<[1], [1], [0], [0], [0, 0, 1, 0], [], []>} : vector<8x8xf32>, vector<8x8xf32>, vector<8x8xf32> -> vector<8x8xf32>
    %95 = arith.addf %94, %6 : vector<8x8xf32>
    %cst_27 = arith.constant dense<0xFF800000> : vector<8xf32>
    %96 = vector.multi_reduction <maximumf>, %95, %cst_27 [1] : vector<8x8xf32> to vector<8xf32>
    %97 = vector.shape_cast %96 : vector<8xf32> to vector<8x1xf32>
    %98 = vector.broadcast %97 : vector<8x1xf32> to vector<8x8xf32>
    %99 = arith.subf %95, %98 : vector<8x8xf32>
    %100 = math.exp %99 : vector<8x8xf32>
    %cst_28 = arith.constant dense<0.000000e+00> : vector<8xf32>
    %101 = vector.multi_reduction <add>, %100, %cst_28 [1] : vector<8x8xf32> to vector<8xf32>
    %102 = vector.shape_cast %101 : vector<8xf32> to vector<8x1xf32>
    %103 = tpu.reciprocal %102 {approx = true} : vector<8x1xf32> -> vector<8x1xf32>
    %104 = vector.broadcast %103 : vector<8x1xf32> to vector<8x8xf32>
    %105 = arith.mulf %100, %104 : vector<8x8xf32>
    %cst_29 = arith.constant dense<0.000000e+00> : vector<8x8xf32>
    %106 = tpu.matmul %105, %93, %cst_29 {dimension_numbers = #tpu.dot_dimension_numbers<[1], [0], [0], [1], [0, 0, 1, 1], [], []>} : vector<8x8xf32>, vector<8x8xf32>, vector<8x8xf32> -> vector<8x8xf32>
    %107 = tpu.concatenate %58, %74, %90, %106 in 1 : vector<8x8xf32>, vector<8x8xf32>, vector<8x8xf32>, vector<8x8xf32> -> vector<8x32xf32>
    %c0_30 = arith.constant 0 : index
    %c0_31 = arith.constant 0 : index
    %c0_32 = arith.constant 0 : index
    %108 = vector.load %arg3[%c0_30, %c0_31, %c0_32] : memref<2x32x32xf32, #tpu.memory_space<vmem>>, vector<1x32x32xf32>
    %109 = vector.shape_cast %108 : vector<1x32x32xf32> to vector<32x32xf32>
    %cst_33 = arith.constant dense<0.000000e+00> : vector<8x32xf32>
    %110 = tpu.matmul %107, %109, %cst_33 {dimension_numbers = #tpu.dot_dimension_numbers<[1], [0], [0], [1], [0, 0, 1, 1], [], []>} : vector<8x32xf32>, vector<32x32xf32>, vector<8x32xf32> -> vector<8x32xf32>
    %111 = arith.addf %0, %110 : vector<8x32xf32>
    %112 = vector.broadcast %11 : vector<1x32xf32> to vector<8x32xf32>
    %113 = arith.addf %111, %112 : vector<8x32xf32>
    %cst_34 = arith.constant dense<0.000000e+00> : vector<8xf32>
    %114 = vector.multi_reduction <add>, %113, %cst_34 [1] : vector<8x32xf32> to vector<8xf32>
    %115 = vector.shape_cast %114 : vector<8xf32> to vector<8x1xf32>
    %cst_35 = arith.constant 3.200000e+01 : f32
    %116 = vector.broadcast %cst_35 : f32 to vector<8x1xf32>
    %117 = arith.divf %115, %116 : vector<8x1xf32>
    %118 = vector.broadcast %117 : vector<8x1xf32> to vector<8x32xf32>
    %119 = arith.subf %113, %118 : vector<8x32xf32>
    %120 = vector.broadcast %117 : vector<8x1xf32> to vector<8x32xf32>
    %121 = arith.subf %113, %120 : vector<8x32xf32>
    %122 = arith.mulf %119, %121 : vector<8x32xf32>
    %cst_36 = arith.constant dense<0.000000e+00> : vector<8xf32>
    %123 = vector.multi_reduction <add>, %122, %cst_36 [1] : vector<8x32xf32> to vector<8xf32>
    %124 = vector.shape_cast %123 : vector<8xf32> to vector<8x1xf32>
    %cst_37 = arith.constant 3.200000e+01 : f32
    %125 = vector.broadcast %cst_37 : f32 to vector<8x1xf32>
    %126 = arith.divf %124, %125 : vector<8x1xf32>
    %127 = vector.broadcast %117 : vector<8x1xf32> to vector<8x32xf32>
    %128 = arith.subf %113, %127 : vector<8x32xf32>
    %cst_38 = arith.constant 9.99999974E-6 : f32
    %129 = vector.broadcast %cst_38 : f32 to vector<8x1xf32>
    %130 = arith.addf %126, %129 : vector<8x1xf32>
    %131 = math.rsqrt %130 : vector<8x1xf32>
    %132 = vector.broadcast %131 : vector<8x1xf32> to vector<8x32xf32>
    %133 = arith.mulf %128, %132 : vector<8x32xf32>
    %134 = vector.broadcast %12 : vector<1x32xf32> to vector<8x32xf32>
    %135 = arith.mulf %133, %134 : vector<8x32xf32>
    %136 = vector.broadcast %13 : vector<1x32xf32> to vector<8x32xf32>
    %137 = arith.addf %135, %136 : vector<8x32xf32>
    %c0_39 = arith.constant 0 : index
    %c0_40 = arith.constant 0 : index
    %c0_41 = arith.constant 0 : index
    %138 = vector.load %arg4[%c0_39, %c0_40, %c0_41] : memref<2x32x128xf32, #tpu.memory_space<vmem>>, vector<1x32x128xf32>
    %139 = vector.shape_cast %138 : vector<1x32x128xf32> to vector<32x128xf32>
    %cst_42 = arith.constant dense<0.000000e+00> : vector<8x128xf32>
    %140 = tpu.matmul %137, %139, %cst_42 {dimension_numbers = #tpu.dot_dimension_numbers<[1], [0], [0], [1], [0, 0, 1, 1], [], []>} : vector<8x32xf32>, vector<32x128xf32>, vector<8x128xf32> -> vector<8x128xf32>
    %141 = vector.broadcast %15 : vector<1x128xf32> to vector<8x128xf32>
    %142 = arith.addf %140, %141 : vector<8x128xf32>
    %cst_43 = arith.constant 0.000000e+00 : f32
    %143 = vector.broadcast %cst_43 : f32 to vector<8x128xf32>
    %144 = arith.maximumf %142, %143 : vector<8x128xf32>
    %c0_44 = arith.constant 0 : index
    %c0_45 = arith.constant 0 : index
    %c0_46 = arith.constant 0 : index
    %145 = vector.load %arg5[%c0_44, %c0_45, %c0_46] : memref<2x128x32xf32, #tpu.memory_space<vmem>>, vector<1x128x32xf32>
    %146 = vector.shape_cast %145 : vector<1x128x32xf32> to vector<128x32xf32>
    %cst_47 = arith.constant dense<0.000000e+00> : vector<8x32xf32>
    %147 = tpu.matmul %144, %146, %cst_47 {dimension_numbers = #tpu.dot_dimension_numbers<[1], [0], [0], [1], [0, 0, 1, 1], [], []>} : vector<8x128xf32>, vector<128x32xf32>, vector<8x32xf32> -> vector<8x32xf32>
    %148 = arith.addf %113, %147 : vector<8x32xf32>
    %149 = vector.broadcast %14 : vector<1x32xf32> to vector<8x32xf32>
    %150 = arith.addf %148, %149 : vector<8x32xf32>
    %c1 = arith.constant 1 : index
    %c0_48 = arith.constant 0 : index
    %c0_49 = arith.constant 0 : index
    %151 = vector.load %arg6[%c1, %c0_48, %c0_49] : memref<3x8x128xf32, #tpu.memory_space<vmem>>, vector<1x8x128xf32>
    %152 = vector.shape_cast %151 : vector<1x8x128xf32> to vector<8x128xf32>
    %153 = vector.extract_strided_slice %152 {offsets = [0, 0], sizes = [1, 32], strides = [1, 1]} : vector<8x128xf32> to vector<1x32xf32>
    %154 = vector.extract_strided_slice %152 {offsets = [1, 0], sizes = [1, 32], strides = [1, 1]} : vector<8x128xf32> to vector<1x32xf32>
    %155 = vector.extract_strided_slice %152 {offsets = [2, 0], sizes = [1, 32], strides = [1, 1]} : vector<8x128xf32> to vector<1x32xf32>
    %156 = vector.extract_strided_slice %152 {offsets = [3, 0], sizes = [1, 32], strides = [1, 1]} : vector<8x128xf32> to vector<1x32xf32>
    %157 = vector.extract_strided_slice %152 {offsets = [4, 0], sizes = [1, 32], strides = [1, 1]} : vector<8x128xf32> to vector<1x32xf32>
    %158 = vector.extract_strided_slice %152 {offsets = [5, 0], sizes = [1, 32], strides = [1, 1]} : vector<8x128xf32> to vector<1x32xf32>
    %159 = vector.extract_strided_slice %152 {offsets = [6, 0], sizes = [1, 128], strides = [1, 1]} : vector<8x128xf32> to vector<1x128xf32>
    %cst_50 = arith.constant dense<0.000000e+00> : vector<8xf32>
    %160 = vector.multi_reduction <add>, %150, %cst_50 [1] : vector<8x32xf32> to vector<8xf32>
    %161 = vector.shape_cast %160 : vector<8xf32> to vector<8x1xf32>
    %cst_51 = arith.constant 3.200000e+01 : f32
    %162 = vector.broadcast %cst_51 : f32 to vector<8x1xf32>
    %163 = arith.divf %161, %162 : vector<8x1xf32>
    %164 = vector.broadcast %163 : vector<8x1xf32> to vector<8x32xf32>
    %165 = arith.subf %150, %164 : vector<8x32xf32>
    %166 = vector.broadcast %163 : vector<8x1xf32> to vector<8x32xf32>
    %167 = arith.subf %150, %166 : vector<8x32xf32>
    %168 = arith.mulf %165, %167 : vector<8x32xf32>
    %cst_52 = arith.constant dense<0.000000e+00> : vector<8xf32>
    %169 = vector.multi_reduction <add>, %168, %cst_52 [1] : vector<8x32xf32> to vector<8xf32>
    %170 = vector.shape_cast %169 : vector<8xf32> to vector<8x1xf32>
    %cst_53 = arith.constant 3.200000e+01 : f32
    %171 = vector.broadcast %cst_53 : f32 to vector<8x1xf32>
    %172 = arith.divf %170, %171 : vector<8x1xf32>
    %173 = vector.broadcast %163 : vector<8x1xf32> to vector<8x32xf32>
    %174 = arith.subf %150, %173 : vector<8x32xf32>
    %cst_54 = arith.constant 9.99999974E-6 : f32
    %175 = vector.broadcast %cst_54 : f32 to vector<8x1xf32>
    %176 = arith.addf %172, %175 : vector<8x1xf32>
    %177 = math.rsqrt %176 : vector<8x1xf32>
    %178 = vector.broadcast %177 : vector<8x1xf32> to vector<8x32xf32>
    %179 = arith.mulf %174, %178 : vector<8x32xf32>
    %180 = vector.broadcast %153 : vector<1x32xf32> to vector<8x32xf32>
    %181 = arith.mulf %179, %180 : vector<8x32xf32>
    %182 = vector.broadcast %154 : vector<1x32xf32> to vector<8x32xf32>
    %183 = arith.addf %181, %182 : vector<8x32xf32>
    %c1_55 = arith.constant 1 : index
    %c0_56 = arith.constant 0 : index
    %c0_57 = arith.constant 0 : index
    %184 = vector.load %arg2[%c1_55, %c0_56, %c0_57] : memref<2x32x96xf32, #tpu.memory_space<vmem>>, vector<1x32x96xf32>
    %185 = vector.shape_cast %184 : vector<1x32x96xf32> to vector<32x96xf32>
    %cst_58 = arith.constant dense<0.000000e+00> : vector<8x96xf32>
    %186 = tpu.matmul %183, %185, %cst_58 {dimension_numbers = #tpu.dot_dimension_numbers<[1], [0], [0], [1], [0, 0, 1, 1], [], []>} : vector<8x32xf32>, vector<32x96xf32>, vector<8x96xf32> -> vector<8x96xf32>
    %187 = vector.extract_strided_slice %186 {offsets = [0, 0], sizes = [8, 8], strides = [1, 1]} : vector<8x96xf32> to vector<8x8xf32>
    %188 = vector.extract_strided_slice %186 {offsets = [0, 32], sizes = [8, 8], strides = [1, 1]} : vector<8x96xf32> to vector<8x8xf32>
    %189 = vector.extract_strided_slice %186 {offsets = [0, 64], sizes = [8, 8], strides = [1, 1]} : vector<8x96xf32> to vector<8x8xf32>
    %cst_59 = arith.constant dense<0.000000e+00> : vector<8x8xf32>
    %190 = tpu.matmul %187, %188, %cst_59 {dimension_numbers = #tpu.dot_dimension_numbers<[1], [1], [0], [0], [0, 0, 1, 0], [], []>} : vector<8x8xf32>, vector<8x8xf32>, vector<8x8xf32> -> vector<8x8xf32>
    %191 = arith.addf %190, %6 : vector<8x8xf32>
    %cst_60 = arith.constant dense<0xFF800000> : vector<8xf32>
    %192 = vector.multi_reduction <maximumf>, %191, %cst_60 [1] : vector<8x8xf32> to vector<8xf32>
    %193 = vector.shape_cast %192 : vector<8xf32> to vector<8x1xf32>
    %194 = vector.broadcast %193 : vector<8x1xf32> to vector<8x8xf32>
    %195 = arith.subf %191, %194 : vector<8x8xf32>
    %196 = math.exp %195 : vector<8x8xf32>
    %cst_61 = arith.constant dense<0.000000e+00> : vector<8xf32>
    %197 = vector.multi_reduction <add>, %196, %cst_61 [1] : vector<8x8xf32> to vector<8xf32>
    %198 = vector.shape_cast %197 : vector<8xf32> to vector<8x1xf32>
    %199 = tpu.reciprocal %198 {approx = true} : vector<8x1xf32> -> vector<8x1xf32>
    %200 = vector.broadcast %199 : vector<8x1xf32> to vector<8x8xf32>
    %201 = arith.mulf %196, %200 : vector<8x8xf32>
    %cst_62 = arith.constant dense<0.000000e+00> : vector<8x8xf32>
    %202 = tpu.matmul %201, %189, %cst_62 {dimension_numbers = #tpu.dot_dimension_numbers<[1], [0], [0], [1], [0, 0, 1, 1], [], []>} : vector<8x8xf32>, vector<8x8xf32>, vector<8x8xf32> -> vector<8x8xf32>
    %203 = vector.extract_strided_slice %186 {offsets = [0, 8], sizes = [8, 8], strides = [1, 1]} : vector<8x96xf32> to vector<8x8xf32>
    %204 = vector.extract_strided_slice %186 {offsets = [0, 40], sizes = [8, 8], strides = [1, 1]} : vector<8x96xf32> to vector<8x8xf32>
    %205 = vector.extract_strided_slice %186 {offsets = [0, 72], sizes = [8, 8], strides = [1, 1]} : vector<8x96xf32> to vector<8x8xf32>
    %cst_63 = arith.constant dense<0.000000e+00> : vector<8x8xf32>
    %206 = tpu.matmul %203, %204, %cst_63 {dimension_numbers = #tpu.dot_dimension_numbers<[1], [1], [0], [0], [0, 0, 1, 0], [], []>} : vector<8x8xf32>, vector<8x8xf32>, vector<8x8xf32> -> vector<8x8xf32>
    %207 = arith.addf %206, %6 : vector<8x8xf32>
    %cst_64 = arith.constant dense<0xFF800000> : vector<8xf32>
    %208 = vector.multi_reduction <maximumf>, %207, %cst_64 [1] : vector<8x8xf32> to vector<8xf32>
    %209 = vector.shape_cast %208 : vector<8xf32> to vector<8x1xf32>
    %210 = vector.broadcast %209 : vector<8x1xf32> to vector<8x8xf32>
    %211 = arith.subf %207, %210 : vector<8x8xf32>
    %212 = math.exp %211 : vector<8x8xf32>
    %cst_65 = arith.constant dense<0.000000e+00> : vector<8xf32>
    %213 = vector.multi_reduction <add>, %212, %cst_65 [1] : vector<8x8xf32> to vector<8xf32>
    %214 = vector.shape_cast %213 : vector<8xf32> to vector<8x1xf32>
    %215 = tpu.reciprocal %214 {approx = true} : vector<8x1xf32> -> vector<8x1xf32>
    %216 = vector.broadcast %215 : vector<8x1xf32> to vector<8x8xf32>
    %217 = arith.mulf %212, %216 : vector<8x8xf32>
    %cst_66 = arith.constant dense<0.000000e+00> : vector<8x8xf32>
    %218 = tpu.matmul %217, %205, %cst_66 {dimension_numbers = #tpu.dot_dimension_numbers<[1], [0], [0], [1], [0, 0, 1, 1], [], []>} : vector<8x8xf32>, vector<8x8xf32>, vector<8x8xf32> -> vector<8x8xf32>
    %219 = vector.extract_strided_slice %186 {offsets = [0, 16], sizes = [8, 8], strides = [1, 1]} : vector<8x96xf32> to vector<8x8xf32>
    %220 = vector.extract_strided_slice %186 {offsets = [0, 48], sizes = [8, 8], strides = [1, 1]} : vector<8x96xf32> to vector<8x8xf32>
    %221 = vector.extract_strided_slice %186 {offsets = [0, 80], sizes = [8, 8], strides = [1, 1]} : vector<8x96xf32> to vector<8x8xf32>
    %cst_67 = arith.constant dense<0.000000e+00> : vector<8x8xf32>
    %222 = tpu.matmul %219, %220, %cst_67 {dimension_numbers = #tpu.dot_dimension_numbers<[1], [1], [0], [0], [0, 0, 1, 0], [], []>} : vector<8x8xf32>, vector<8x8xf32>, vector<8x8xf32> -> vector<8x8xf32>
    %223 = arith.addf %222, %6 : vector<8x8xf32>
    %cst_68 = arith.constant dense<0xFF800000> : vector<8xf32>
    %224 = vector.multi_reduction <maximumf>, %223, %cst_68 [1] : vector<8x8xf32> to vector<8xf32>
    %225 = vector.shape_cast %224 : vector<8xf32> to vector<8x1xf32>
    %226 = vector.broadcast %225 : vector<8x1xf32> to vector<8x8xf32>
    %227 = arith.subf %223, %226 : vector<8x8xf32>
    %228 = math.exp %227 : vector<8x8xf32>
    %cst_69 = arith.constant dense<0.000000e+00> : vector<8xf32>
    %229 = vector.multi_reduction <add>, %228, %cst_69 [1] : vector<8x8xf32> to vector<8xf32>
    %230 = vector.shape_cast %229 : vector<8xf32> to vector<8x1xf32>
    %231 = tpu.reciprocal %230 {approx = true} : vector<8x1xf32> -> vector<8x1xf32>
    %232 = vector.broadcast %231 : vector<8x1xf32> to vector<8x8xf32>
    %233 = arith.mulf %228, %232 : vector<8x8xf32>
    %cst_70 = arith.constant dense<0.000000e+00> : vector<8x8xf32>
    %234 = tpu.matmul %233, %221, %cst_70 {dimension_numbers = #tpu.dot_dimension_numbers<[1], [0], [0], [1], [0, 0, 1, 1], [], []>} : vector<8x8xf32>, vector<8x8xf32>, vector<8x8xf32> -> vector<8x8xf32>
    %235 = vector.extract_strided_slice %186 {offsets = [0, 24], sizes = [8, 8], strides = [1, 1]} : vector<8x96xf32> to vector<8x8xf32>
    %236 = vector.extract_strided_slice %186 {offsets = [0, 56], sizes = [8, 8], strides = [1, 1]} : vector<8x96xf32> to vector<8x8xf32>
    %237 = vector.extract_strided_slice %186 {offsets = [0, 88], sizes = [8, 8], strides = [1, 1]} : vector<8x96xf32> to vector<8x8xf32>
    %cst_71 = arith.constant dense<0.000000e+00> : vector<8x8xf32>
    %238 = tpu.matmul %235, %236, %cst_71 {dimension_numbers = #tpu.dot_dimension_numbers<[1], [1], [0], [0], [0, 0, 1, 0], [], []>} : vector<8x8xf32>, vector<8x8xf32>, vector<8x8xf32> -> vector<8x8xf32>
    %239 = arith.addf %238, %6 : vector<8x8xf32>
    %cst_72 = arith.constant dense<0xFF800000> : vector<8xf32>
    %240 = vector.multi_reduction <maximumf>, %239, %cst_72 [1] : vector<8x8xf32> to vector<8xf32>
    %241 = vector.shape_cast %240 : vector<8xf32> to vector<8x1xf32>
    %242 = vector.broadcast %241 : vector<8x1xf32> to vector<8x8xf32>
    %243 = arith.subf %239, %242 : vector<8x8xf32>
    %244 = math.exp %243 : vector<8x8xf32>
    %cst_73 = arith.constant dense<0.000000e+00> : vector<8xf32>
    %245 = vector.multi_reduction <add>, %244, %cst_73 [1] : vector<8x8xf32> to vector<8xf32>
    %246 = vector.shape_cast %245 : vector<8xf32> to vector<8x1xf32>
    %247 = tpu.reciprocal %246 {approx = true} : vector<8x1xf32> -> vector<8x1xf32>
    %248 = vector.broadcast %247 : vector<8x1xf32> to vector<8x8xf32>
    %249 = arith.mulf %244, %248 : vector<8x8xf32>
    %cst_74 = arith.constant dense<0.000000e+00> : vector<8x8xf32>
    %250 = tpu.matmul %249, %237, %cst_74 {dimension_numbers = #tpu.dot_dimension_numbers<[1], [0], [0], [1], [0, 0, 1, 1], [], []>} : vector<8x8xf32>, vector<8x8xf32>, vector<8x8xf32> -> vector<8x8xf32>
    %251 = tpu.concatenate %202, %218, %234, %250 in 1 : vector<8x8xf32>, vector<8x8xf32>, vector<8x8xf32>, vector<8x8xf32> -> vector<8x32xf32>
    %c1_75 = arith.constant 1 : index
    %c0_76 = arith.constant 0 : index
    %c0_77 = arith.constant 0 : index
    %252 = vector.load %arg3[%c1_75, %c0_76, %c0_77] : memref<2x32x32xf32, #tpu.memory_space<vmem>>, vector<1x32x32xf32>
    %253 = vector.shape_cast %252 : vector<1x32x32xf32> to vector<32x32xf32>
    %cst_78 = arith.constant dense<0.000000e+00> : vector<8x32xf32>
    %254 = tpu.matmul %251, %253, %cst_78 {dimension_numbers = #tpu.dot_dimension_numbers<[1], [0], [0], [1], [0, 0, 1, 1], [], []>} : vector<8x32xf32>, vector<32x32xf32>, vector<8x32xf32> -> vector<8x32xf32>
    %255 = arith.addf %150, %254 : vector<8x32xf32>
    %256 = vector.broadcast %155 : vector<1x32xf32> to vector<8x32xf32>
    %257 = arith.addf %255, %256 : vector<8x32xf32>
    %cst_79 = arith.constant dense<0.000000e+00> : vector<8xf32>
    %258 = vector.multi_reduction <add>, %257, %cst_79 [1] : vector<8x32xf32> to vector<8xf32>
    %259 = vector.shape_cast %258 : vector<8xf32> to vector<8x1xf32>
    %cst_80 = arith.constant 3.200000e+01 : f32
    %260 = vector.broadcast %cst_80 : f32 to vector<8x1xf32>
    %261 = arith.divf %259, %260 : vector<8x1xf32>
    %262 = vector.broadcast %261 : vector<8x1xf32> to vector<8x32xf32>
    %263 = arith.subf %257, %262 : vector<8x32xf32>
    %264 = vector.broadcast %261 : vector<8x1xf32> to vector<8x32xf32>
    %265 = arith.subf %257, %264 : vector<8x32xf32>
    %266 = arith.mulf %263, %265 : vector<8x32xf32>
    %cst_81 = arith.constant dense<0.000000e+00> : vector<8xf32>
    %267 = vector.multi_reduction <add>, %266, %cst_81 [1] : vector<8x32xf32> to vector<8xf32>
    %268 = vector.shape_cast %267 : vector<8xf32> to vector<8x1xf32>
    %cst_82 = arith.constant 3.200000e+01 : f32
    %269 = vector.broadcast %cst_82 : f32 to vector<8x1xf32>
    %270 = arith.divf %268, %269 : vector<8x1xf32>
    %271 = vector.broadcast %261 : vector<8x1xf32> to vector<8x32xf32>
    %272 = arith.subf %257, %271 : vector<8x32xf32>
    %cst_83 = arith.constant 9.99999974E-6 : f32
    %273 = vector.broadcast %cst_83 : f32 to vector<8x1xf32>
    %274 = arith.addf %270, %273 : vector<8x1xf32>
    %275 = math.rsqrt %274 : vector<8x1xf32>
    %276 = vector.broadcast %275 : vector<8x1xf32> to vector<8x32xf32>
    %277 = arith.mulf %272, %276 : vector<8x32xf32>
    %278 = vector.broadcast %156 : vector<1x32xf32> to vector<8x32xf32>
    %279 = arith.mulf %277, %278 : vector<8x32xf32>
    %280 = vector.broadcast %157 : vector<1x32xf32> to vector<8x32xf32>
    %281 = arith.addf %279, %280 : vector<8x32xf32>
    %c1_84 = arith.constant 1 : index
    %c0_85 = arith.constant 0 : index
    %c0_86 = arith.constant 0 : index
    %282 = vector.load %arg4[%c1_84, %c0_85, %c0_86] : memref<2x32x128xf32, #tpu.memory_space<vmem>>, vector<1x32x128xf32>
    %283 = vector.shape_cast %282 : vector<1x32x128xf32> to vector<32x128xf32>
    %cst_87 = arith.constant dense<0.000000e+00> : vector<8x128xf32>
    %284 = tpu.matmul %281, %283, %cst_87 {dimension_numbers = #tpu.dot_dimension_numbers<[1], [0], [0], [1], [0, 0, 1, 1], [], []>} : vector<8x32xf32>, vector<32x128xf32>, vector<8x128xf32> -> vector<8x128xf32>
    %285 = vector.broadcast %159 : vector<1x128xf32> to vector<8x128xf32>
    %286 = arith.addf %284, %285 : vector<8x128xf32>
    %cst_88 = arith.constant 0.000000e+00 : f32
    %287 = vector.broadcast %cst_88 : f32 to vector<8x128xf32>
    %288 = arith.maximumf %286, %287 : vector<8x128xf32>
    %c1_89 = arith.constant 1 : index
    %c0_90 = arith.constant 0 : index
    %c0_91 = arith.constant 0 : index
    %289 = vector.load %arg5[%c1_89, %c0_90, %c0_91] : memref<2x128x32xf32, #tpu.memory_space<vmem>>, vector<1x128x32xf32>
    %290 = vector.shape_cast %289 : vector<1x128x32xf32> to vector<128x32xf32>
    %cst_92 = arith.constant dense<0.000000e+00> : vector<8x32xf32>
    %291 = tpu.matmul %288, %290, %cst_92 {dimension_numbers = #tpu.dot_dimension_numbers<[1], [0], [0], [1], [0, 0, 1, 1], [], []>} : vector<8x128xf32>, vector<128x32xf32>, vector<8x32xf32> -> vector<8x32xf32>
    %292 = arith.addf %257, %291 : vector<8x32xf32>
    %293 = vector.broadcast %158 : vector<1x32xf32> to vector<8x32xf32>
    %294 = arith.addf %292, %293 : vector<8x32xf32>
    %c2 = arith.constant 2 : index
    %c0_93 = arith.constant 0 : index
    %c0_94 = arith.constant 0 : index
    %295 = vector.load %arg6[%c2, %c0_93, %c0_94] : memref<3x8x128xf32, #tpu.memory_space<vmem>>, vector<1x8x128xf32>
    %296 = vector.shape_cast %295 : vector<1x8x128xf32> to vector<8x128xf32>
    %297 = vector.extract_strided_slice %296 {offsets = [0, 0], sizes = [1, 32], strides = [1, 1]} : vector<8x128xf32> to vector<1x32xf32>
    %298 = vector.extract_strided_slice %296 {offsets = [1, 0], sizes = [1, 32], strides = [1, 1]} : vector<8x128xf32> to vector<1x32xf32>
    %299 = vector.extract_strided_slice %296 {offsets = [2, 0], sizes = [1, 128], strides = [1, 1]} : vector<8x128xf32> to vector<1x128xf32>
    %cst_95 = arith.constant dense<0.000000e+00> : vector<8xf32>
    %300 = vector.multi_reduction <add>, %294, %cst_95 [1] : vector<8x32xf32> to vector<8xf32>
    %301 = vector.shape_cast %300 : vector<8xf32> to vector<8x1xf32>
    %cst_96 = arith.constant 3.200000e+01 : f32
    %302 = vector.broadcast %cst_96 : f32 to vector<8x1xf32>
    %303 = arith.divf %301, %302 : vector<8x1xf32>
    %304 = vector.broadcast %303 : vector<8x1xf32> to vector<8x32xf32>
    %305 = arith.subf %294, %304 : vector<8x32xf32>
    %306 = vector.broadcast %303 : vector<8x1xf32> to vector<8x32xf32>
    %307 = arith.subf %294, %306 : vector<8x32xf32>
    %308 = arith.mulf %305, %307 : vector<8x32xf32>
    %cst_97 = arith.constant dense<0.000000e+00> : vector<8xf32>
    %309 = vector.multi_reduction <add>, %308, %cst_97 [1] : vector<8x32xf32> to vector<8xf32>
    %310 = vector.shape_cast %309 : vector<8xf32> to vector<8x1xf32>
    %cst_98 = arith.constant 3.200000e+01 : f32
    %311 = vector.broadcast %cst_98 : f32 to vector<8x1xf32>
    %312 = arith.divf %310, %311 : vector<8x1xf32>
    %313 = vector.broadcast %303 : vector<8x1xf32> to vector<8x32xf32>
    %314 = arith.subf %294, %313 : vector<8x32xf32>
    %cst_99 = arith.constant 9.99999974E-6 : f32
    %315 = vector.broadcast %cst_99 : f32 to vector<8x1xf32>
    %316 = arith.addf %312, %315 : vector<8x1xf32>
    %317 = math.rsqrt %316 : vector<8x1xf32>
    %318 = vector.broadcast %317 : vector<8x1xf32> to vector<8x32xf32>
    %319 = arith.mulf %314, %318 : vector<8x32xf32>
    %320 = vector.broadcast %297 : vector<1x32xf32> to vector<8x32xf32>
    %321 = arith.mulf %319, %320 : vector<8x32xf32>
    %322 = vector.broadcast %298 : vector<1x32xf32> to vector<8x32xf32>
    %323 = arith.addf %321, %322 : vector<8x32xf32>
    %c0_100 = arith.constant 0 : index
    %c0_101 = arith.constant 0 : index
    %324 = vector.load %arg7[%c0_100, %c0_101] : memref<32x128xf32, #tpu.memory_space<vmem>>, vector<32x128xf32>
    %cst_102 = arith.constant dense<0.000000e+00> : vector<8x128xf32>
    %325 = tpu.matmul %323, %324, %cst_102 {dimension_numbers = #tpu.dot_dimension_numbers<[1], [0], [0], [1], [0, 0, 1, 1], [], []>} : vector<8x32xf32>, vector<32x128xf32>, vector<8x128xf32> -> vector<8x128xf32>
    %326 = vector.broadcast %299 : vector<1x128xf32> to vector<8x128xf32>
    %327 = arith.addf %325, %326 : vector<8x128xf32>
    %c0_103 = arith.constant 0 : index
    %c0_104 = arith.constant 0 : index
    %328 = vector.load %arg8[%c0_103, %c0_104] : memref<8x128xf32, #tpu.memory_space<vmem>>, vector<8x128xf32>
    tpu.vector_store %arg8[%c0_103, %c0_104], %327 {strides = array<i32>} : memref<8x128xf32, #tpu.memory_space<vmem>>, vector<8x128xf32>,
    return
  }
  func.func @transform_0(%arg0: i32) -> (i32, i32) {
    %c0_i32 = arith.constant 0 : i32
    %c0_i32_0 = arith.constant 0 : i32
    return %arg0, %c0_i32 : i32, i32
  }
  func.func @transform_1(%arg0: i32) -> (i32, i32, i32) {
    %c0_i32 = arith.constant 0 : i32
    %c0_i32_0 = arith.constant 0 : i32
    %c0_i32_1 = arith.constant 0 : i32
    %c0_i32_2 = arith.constant 0 : i32
    return %c0_i32, %c0_i32_0, %c0_i32_1 : i32, i32, i32
  }
  func.func @transform_2(%arg0: i32) -> (i32, i32, i32) {
    %c0_i32 = arith.constant 0 : i32
    %c0_i32_0 = arith.constant 0 : i32
    %c0_i32_1 = arith.constant 0 : i32
    %c0_i32_2 = arith.constant 0 : i32
    return %c0_i32, %c0_i32_0, %c0_i32_1 : i32, i32, i32
  }
  func.func @transform_3(%arg0: i32) -> (i32, i32, i32) {
    %c0_i32 = arith.constant 0 : i32
    %c0_i32_0 = arith.constant 0 : i32
    %c0_i32_1 = arith.constant 0 : i32
    %c0_i32_2 = arith.constant 0 : i32
    return %c0_i32, %c0_i32_0, %c0_i32_1 : i32, i32, i32
  }
  func.func @transform_4(%arg0: i32) -> (i32, i32, i32) {
    %c0_i32 = arith.constant 0 : i32
    %c0_i32_0 = arith.constant 0 : i32
    %c0_i32_1 = arith.constant 0 : i32
    %c0_i32_2 = arith.constant 0 : i32
    return %c0_i32, %c0_i32_0, %c0_i32_1 : i32, i32, i32
  }
  func.func @transform_5(%arg0: i32) -> (i32, i32, i32) {
    %c0_i32 = arith.constant 0 : i32
    %c0_i32_0 = arith.constant 0 : i32
    %c0_i32_1 = arith.constant 0 : i32
    %c0_i32_2 = arith.constant 0 : i32
    return %c0_i32, %c0_i32_0, %c0_i32_1 : i32, i32, i32
  }
  func.func @transform_6(%arg0: i32) -> (i32, i32) {
    %c0_i32 = arith.constant 0 : i32
    %c0_i32_0 = arith.constant 0 : i32
    %c0_i32_1 = arith.constant 0 : i32
    return %c0_i32, %c0_i32_0 : i32, i32
  }
  func.func @transform_7(%arg0: i32) -> (i32, i32) {
    %c0_i32 = arith.constant 0 : i32
    %c0_i32_0 = arith.constant 0 : i32
    return %arg0, %c0_i32 : i32, i32
  }
}

</mosaic_0001>

<bundles_post_ra>
// kernel: tpu_custom_call.1
= control target key start
LH: loop header
LB: loop body
LE: loop exit
PB: predicated region body
PF: predicated region fallthrough
CT: control target
= control target key end

     0   :  { %12 = vsyncpa [#allocation3], 0  ;;  %s2079_s0 = inlined_call_operand.vmem [shape: f32[16,32], index: 0, kind: input, shape index: {}]   ;;  %s2080_s1 = inlined_call_operand.vmem [shape: f32[2,32,96], index: 1, kind: input, shape index: {}]   ;;  %s2081_s2 = inlined_call_operand.vmem [shape: f32[2,32,32], index: 2, kind: input, shape index: {}]   ;;  %s2082_s3 = inlined_call_operand.vmem [shape: f32[2,32,128], index: 3, kind: input, shape index: {}]   ;;  %s2083_s4 = inlined_call_operand.vmem [shape: f32[2,128,32], index: 4, kind: input, shape index: {}]   ;;  %s2084_s5 = inlined_call_operand.vmem [shape: f32[3,8,128], index: 5, kind: input, shape index: {}]   ;;  %s2085_s6 = inlined_call_operand.vmem [shape: f32[32,128], index: 6, kind: input, shape index: {}]   ;;  %s2086_s7 = inlined_call_operand.hbm [shape: f32[16,128], index: 7, kind: output, shape index: {}]  }
   0x1   :  { %14 = vsyncpa [#allocation3 + $0x1], 0  ;;  %s1623_s24 = smov 0   ;;  %s1625_s25 = smov 0  }
   0x2   :  { %s1627_s26 = smov 0   ;;  %s1629_s27 = smov 0  }
   0x3 LB: > { %s1644_s28 = sadd.s32 4294967295, %s1565_s27   ;;  %s1333_s29 = sadd.s32 4294967294, %s1565_s27   ;;  %s1565_s27 = sphi %s1629_s27, %s2112_s27   ;;  %s1561_s26 = sphi %s1627_s26, %s2111_s26   ;;  %s1557_s25 = sphi %s1625_s25, %s2110_s25   ;;  %s1553_s24 = sphi %s1623_s24, %s2109_s24  }
   0x4   : > { %s1648_s30 = sadd.s32 1, %s1565_s27   ;;  %s179_s8 = sadd.s32 1, %s1561_s26 }
   0x5   : > { %s176_s9 = ssub.s32 %s1565_s27, %s1648_s30  ;;  %p189_p0 = scmp.ne.s32.totalorder %s1561_s26, %s1557_s25 }
   0x6   : > { %p177_p1 = scmp.eq.s32.totalorder %s176_s9, 0  ;;  %p190_p2 = scmp.eq.s32.totalorder %s1644_s28, 1 }
   0x7   : > { %p195_p3 = scmp.ne.s32.totalorder %s1557_s25, %s1553_s24  ;;  %p196_p4 = scmp.eq.s32.totalorder %s1333_s29, 1 }
   0x8   : > { %s1659_s10 = scalar_select %p177_p1, %s1561_s26, %s179_s8  }
   0x9   : > { %p1661_p5 = por %p190_p2, %p189_p0  ;;  %p1665_p6 = por %p196_p4, %p195_p3 }
   0xa   : > { %p1336_p7 = scmp.ge.s32.totalorder %s1565_s27, 1  ;;  %p239_p8 = scmp.lt.s32.totalorder %s1565_s27, 3 }
   0xc   : > { %p240_p9 = pnand %p1336_p7, %p239_p8 }
   0xd   : > { %p270_p10 = scmp.lt.s32.totalorder (!%p240_p9), %s1644_s28, 1  ;;  %s2094_s15 = smov (!%p240_p9), 64  }
   0xe   : > { %243 = sbr.rel (%p240_p9) target bundleno = 4867 (0x1303), region = 48  ;;  %s1570_s16 = smov (!%p240_p9), 96  }
   0xf   : > { %s1572_s18 = smov (!%p240_p9), 120   ;;  %s2090_s19 = smov (!%p240_p9), 112  }
  0x10   : > { %s2092_s20 = smov (!%p240_p9), 72   ;;  %s2089_s21 = smov (!%p240_p9), 48  }
  0x11   : > { %s2091_s22 = smov (!%p240_p9), 104   ;;  %s2088_s23 = smov (!%p240_p9), 40  }
  0x12   : > { %s1579_s29 = smov (!%p240_p9), 56   ;;  %s2087_s8 = smov (!%p240_p9), 16  }
  0x13   : > { %s271_s13 = scalar_select %p270_p10, %s1644_s28, 1  ;;  %vm282_vm0 = vcmask 261120   ;;  %v1567_v2 = vmov 32.0   ;;  %v319_v14 = vld [vmem:[%s2080_s1 + $0x18] sm:$0xff]  ;;  %v318_v15 = vld [vmem:[%s2080_s1 + $0x10] sm:$0xff]  ;;  %v317_v16 = vld [vmem:[%s2080_s1 + $0x8] sm:$0xff]  ;;  %v275_v42 = vlaneseq }
  0x14   : > { %1459 = vrcp.f32 %v1567_v2  ;;  %335 = vmatpush.msra.mxu0 %v319_v14  ;;  %v316_v17 = vld [vmem:[%s2080_s1] sm:$0xff]  ;;  %vm346_vm5 = vcmask 64512   ;;  %v1575_v45 = vmov -1e+30   ;;  %s2093_s9 = smov 8   ;;  %vm616_vm7 = vcmask 130048  }
  0x15   : > { %s1338_s14 = sshll.u32 %s271_s13, 3  ;;  %v1701_v26 = vld [vmem:[%s2084_s5] sm:$0xff]  ;;  %v276_v43 = vshrl.u32 %v275_v42, 7  ;;  %v278_v44 = vand.u32 127, %v275_v42  ;;  %s2095_s13 = smov 24   ;;  %vm618_vm8 = vcmask 195584  }
  0x16   : > { %s273_s17 = scalar_lea.vmem %s2079_s0, %s1338_s14  ;;  %336 = vmatpush.msra.mxu0 %v318_v15  ;;  %v312_v28 = vperm.slane %v1701_v26, 0  ;;  %v314_v31 = vperm.slane %v1701_v26, 1  ;;  %s1568_s14 = smov 88  }
  0x17   : > { %v1676_v0 = vld [vmem:[%s273_s17] sm:$0xff]  ;;  %s2096_s17 = smov 80   ;;  %vm279_vm6 = vcmp.ge.s32.totalorder %v276_v43, %v278_v44 }
  0x18   : > { %v283_v1 = vsel %vm282_vm0, %v1676_v0, 0.0  ;;  %337 = vmatpush.msra.mxu0 %v317_v16  ;;  %v1729_v46 = vsel %vm279_vm6, 0.0, %v1575_v45 }
  0x19   : > { %284 = vadd.xlane.f32.xlu0 %v283_v1 }
  0x1a   : > { %v1460_v3 = vpop.eup %1459  ;;  %338 = vmatpush.msra.mxu0 %v316_v17 }
  0x1b   : > { %v287_v4 = vmul.f32 32.0, %v1460_v3  ;;  %vm291_vm1 = vweird.f32 %v1460_v3 }
  0x1d   : > { %v288_v5 = vsub.f32 1.0, %v287_v4 }
  0x1f   : > { %v289_v6 = vmul.f32 %v1460_v3, %v288_v5 }
  0x21   : > { %v290_v7 = vadd.f32 %v1460_v3, %v289_v6 }
  0x23   : > { %v1680_v8 = vsel %vm291_vm1, %v1460_v3, %v290_v7 }
  0x8c   : > { %v285_v9 = vpop.xlane.xlu0 %284 }
  0x8d   : > { %v293_v10 = vmul.f32 %v1680_v8, %v285_v9 }
  0x8f   : > { %v294_v11 = vsub.f32 %v1676_v0, %v293_v10 }
  0x91   : > { %v295_v12 = vmul.f32 %v294_v11, %v294_v11 }
  0x93   : > { %v296_v13 = vsel %vm282_vm0, %v295_v12, 0.0 }
  0x94   : > { %297 = vadd.xlane.f32.xlu0 %v296_v13 }
 0x107   : > { %v298_v18 = vpop.xlane.xlu0 %297 }
 0x108   : > { %v299_v19 = vmul.f32 %v298_v18, %v1680_v8 }
 0x10a   : > { %v300_v20 = vadd.f32 1e-05, %v299_v19 }
 0x10c   : > { %1461 = vrsqrt.f32 %v300_v20  ;;  %vm307_vm3 = vweird.f32 %v300_v20 }
 0x112   : > { %v1462_v21 = vpop.eup %1461 }
 0x113   : > { %v302_v22 = vmul.f32 %v1462_v21, %v300_v20  ;;  %vm308_vm2 = vweird.f32 %v1462_v21 }
 0x114   : > { %vm309_vm4 = vmor %vm307_vm3, %vm308_vm2 }
 0x115   : > { %v303_v23 = vmul.f32 %v1462_v21, %v302_v22 }
 0x117   : > { %v304_v24 = vmul.f32 0.5, %v303_v23 }
 0x119   : > { %v305_v25 = vsub.f32 1.5, %v304_v24 }
 0x11b   : > { %v306_v27 = vmul.f32 %v1462_v21, %v305_v25 }
 0x11d   : > { %v310_v29 = vsel %vm309_vm4, %v1462_v21, %v306_v27 }
 0x11e   : > { %v311_v30 = vmul.f32 %v310_v29, %v294_v11 }
 0x120   : > { %v313_v32 = vmul.f32 %v312_v28, %v311_v30 }
 0x122   : > { %v315_v33 = vadd.f32 %v314_v31, %v313_v32 }
 0x124   : > { %1339 = vmatmul.msk.f32.vlgmr.msra.gmra.mxu0 %vm282_vm0, %v315_v33 }
 0x1a1   : > { %v1706_v34 = vpop.f32.mrf.mxu0 }
 0x1a2   : > { %410 = vrot.lane.b32.xlu0 %v1706_v34, %s1568_s14  ;;  %382 = vrot.lane.b32.xlu2 %v1706_v34, %s2094_s15  ;;  %s2103_s15 = smov 112  }
 0x1a3   : > { %344 = vrot.lane.b32.xlu1 %v1706_v34, %s1570_s16 }
 0x1aa   : > { %475 = vrot.lane.b32.xlu0 %v1706_v34, %s2096_s17  ;;  %408 = vrot.lane.b32.xlu2 %v1706_v34, %s1572_s18 }
 0x1b2   : > { %473 = vrot.lane.b32.xlu0 %v1706_v34, %s2090_s19  ;;  %540 = vrot.lane.b32.xlu2 %v1706_v34, %s2092_s20  ;;  %s2104_s19 = smov 48   ;;  %s2105_s20 = smov 8  }
 0x1fc   : > { %v383_v35 = vpop.permute.xlu2 %382 }
 0x1fd   : > { %403 = vmatpush.msra.mxu2 %v383_v35 }
 0x204   : > { %v409_v36 = vpop.permute.xlu2 %408 }
 0x20c   : > { %v541_v37 = vpop.permute.xlu2 %540 }
 0x20d   : > { %1349 = vmatpush.xpose.msk.msrb.mxu0 %vm346_vm5, %v541_v37 }
 0x214   : > { %v411_v38 = vpop.permute.xlu0 %410 }
 0x215   : > { %v345_v39 = vpop.permute.xlu1 %344  ;;  %1343 = vmatpush.xpose.msk.msrb.mxu2 %vm346_vm5, %v411_v38  ;;  %v623_v38 = vld [vmem:[%s2081_s2 + $0x18] sm:$0xff] }
 0x216   : > { %1340 = vmatpush.xpose.msk.msra.mxu1 %vm346_vm5, %v345_v39  ;;  %v622_v39 = vld [vmem:[%s2081_s2 + $0x10] sm:$0xff] }
 0x219   : > { %1341 = vmatmul.msk.f32.vlgmr.msra.gmra.mxu1 %vm346_vm5, %v1706_v34 }
 0x21c   : > { %v476_v40 = vpop.permute.xlu0 %475 }
 0x21d   : > { %1346 = vmatpush.xpose.msk.msrb.mxu1 %vm346_vm5, %v476_v40  ;;  %v621_v40 = vld [vmem:[%s2081_s2 + $0x8] sm:$0xff] }
 0x221   : > { %639 = vmatpush.msra.mxu1 %v623_v38 }
 0x223   : > { %640 = vmatpush.msra.mxu1 %v622_v39 }
 0x224   : > { %v474_v41 = vpop.permute.xlu0 %473 }
 0x225   : > { %1347 = vmatmul.msk.f32.vlgmr.msrb.gmra.mxu1 %vm346_vm5, %v474_v41  ;;  %v620_v41 = vld [vmem:[%s2081_s2] sm:$0xff] }
 0x226   : > { %641 = vmatpush.msra.mxu1 %v621_v40 }
 0x228   : > { %642 = vmatpush.msra.mxu1 %v620_v41 }
 0x296   : > { %v368_v47 = vpop.f32.mrf.mxu1 }
 0x297   : > { %v369_v48 = vadd.f32 %v368_v47, %v1729_v46 }
 0x299   : > { %v371_v49 = vsel %vm346_vm5, %v369_v48, -inf }
 0x29a   : > { %372 = vmax.xlane.f32.xlu1 %v371_v49  ;;  %v648_v49 = vperm.slane %v1701_v26, 2 }
 0x2a2   : > { %v498_v50 = vpop.f32.mrf.mxu1 }
 0x2a3   : > { %v499_v51 = vadd.f32 %v498_v50, %v1729_v46 }
 0x2a5   : > { %v501_v52 = vsel %vm346_vm5, %v499_v51, -inf }
 0x2a6   : > { %502 = vmax.xlane.f32.xlu0 %v501_v52 }
 0x2ba   : > { %512 = vrot.lane.b32.xlu0 %v1706_v34, %s2089_s21  ;;  %s2106_s21 = smov 40  }
 0x30d   : > { %v373_v53 = vpop.xlane.xlu1 %372 }
 0x30e   : > { %v374_v54 = vsub.f32 %v369_v48, %v373_v53 }
 0x310   : > { %v375_v55 = vmul.f32 1.442695, %v374_v54 }
 0x312   : > { %1463 = vpow2.f32 %v375_v55 }
 0x318   : > { %v1464_v56 = vpop.eup %1463 }
 0x319   : > { %v377_v57 = vsel %vm346_vm5, %v1464_v56, 0.0  ;;  %v503_v58 = vpop.xlane.xlu0 %502 }
 0x31a   : > { %378 = vadd.xlane.f32.xlu2 %v377_v57  ;;  %v504_v5 = vsub.f32 %v499_v51, %v503_v58 }
 0x31c   : > { %v505_v6 = vmul.f32 1.442695, %v504_v5 }
 0x32c   : > { %v513_v59 = vpop.permute.xlu0 %512 }
 0x32d   : > { %533 = vmatpush.msra.mxu3 %v513_v59  ;;  %v679_v59 = vld [vmem:[%s2082_s3 + $0x18] sm:$0xff] }
 0x32e   : > { %696 = vmatpush.msrb.mxu1 %v679_v59 }
 0x332   : > { %538 = vrot.lane.b32.xlu2 %v1706_v34, %s2091_s22 }
 0x38d   : > { %v379_v60 = vpop.xlane.xlu2 %378 }
 0x38e   : > { %1465 = vrcp.f32 %v379_v60  ;;  %v677_v60 = vld [vmem:[%s2082_s3 + $0x8] sm:$0xff] }
 0x38f   : > { %1467 = vpow2.f32 %v505_v6  ;;  %v716_v6 = vld [vmem:[%s2083_s4 + $0x58] sm:$0xff] }
 0x394   : > { %v1466_v61 = vpop.eup %1465 }
 0x395   : > { %v539_v62 = vpop.permute.xlu2 %538  ;;  %v381_v63 = vmul.f32 %v1466_v61, %v1464_v56  ;;  %v1468_v11 = vpop.eup %1467  ;;  %v676_v61 = vld [vmem:[%s2082_s3] sm:$0xff] }
 0x396   : > { %1350 = vmatmul.msk.f32.vlgmr.msrb.gmra.mxu0 %vm346_vm5, %v539_v62  ;;  %v507_v12 = vsel %vm346_vm5, %v1468_v11, 0.0  ;;  %v720_v62 = vld [vmem:[%s2083_s4 + $0x78] sm:$0xff] }
 0x397   : > { %1342 = vmatmul.msk.f32.vlgmr.msra.gmra.mxu2 %vm346_vm5, %v381_v63  ;;  %v719_v63 = vld [vmem:[%s2083_s4 + $0x70] sm:$0xff]  ;;  %721 = vmatpush.msra.mxu0 %v720_v62 }
 0x399   : > { %722 = vmatpush.msra.mxu0 %v719_v63 }
 0x39f   : > { %1344 = vmatmul.msk.f32.vlgmr.msrb.gmra.mxu2 %vm346_vm5, %v409_v36 }
 0x413   : > { %v563_v1 = vpop.f32.mrf.mxu0 }
 0x414   : > { %v564_v2 = vadd.f32 %v563_v1, %v1729_v46  ;;  %v718_v1 = vld [vmem:[%s2083_s4 + $0x68] sm:$0xff] }
 0x415   : > { %723 = vmatpush.msra.mxu0 %v718_v1 }
 0x416   : > { %v566_v3 = vsel %vm346_vm5, %v564_v2, -inf }
 0x417   : > { %567 = vmax.xlane.f32.xlu2 %v566_v3 }
 0x41a   : > { %v1745_v4 = vpop.f32.mrf.mxu2 }
 0x422   : > { %v433_v7 = vpop.f32.mrf.mxu2 }
 0x423   : > { %v434_v9 = vadd.f32 %v433_v7, %v1729_v46  ;;  %v715_v7 = vld [vmem:[%s2083_s4 + $0x50] sm:$0xff] }
 0x425   : > { %v436_v10 = vsel %vm346_vm5, %v434_v9, -inf }
 0x426   : > { %437 = vmax.xlane.f32.xlu1 %v436_v10  ;;  %v713_v10 = vld [vmem:[%s2083_s4 + $0x40] sm:$0xff] }
 0x42e   : > { %508 = vadd.xlane.f32.xlu1 %v507_v12  ;;  %v712_v12 = vld [vmem:[%s2083_s4 + $0x38] sm:$0xff] }
 0x42f   : > { %577 = vrot.lane.b32.xlu2 %v1706_v34, %s2088_s23 }
 0x48a   : > { %v568_v13 = vpop.xlane.xlu2 %567 }
 0x48b   : > { %v569_v14 = vsub.f32 %v564_v2, %v568_v13 }
 0x48d   : > { %v570_v15 = vmul.f32 1.442695, %v569_v14  ;;  %v711_v14 = vld [vmem:[%s2083_s4 + $0x30] sm:$0xff] }
 0x48f   : > { %1469 = vpow2.f32 %v570_v15 }
 0x492   : > { %v578_v33 = vpop.permute.xlu2 %577 }
 0x495   : > { %v1470_v16 = vpop.eup %1469 }
 0x496   : > { %v572_v17 = vsel %vm346_vm5, %v1470_v16, 0.0 }
 0x497   : > { %573 = vadd.xlane.f32.xlu1 %v572_v17 }
 0x499   : > { %v438_v18 = vpop.xlane.xlu1 %437 }
 0x49a   : > { %v439_v19 = vsub.f32 %v434_v9, %v438_v18  ;;  %v714_v9 = vld [vmem:[%s2083_s4 + $0x48] sm:$0xff]  ;;  %v709_v18 = vld [vmem:[%s2083_s4 + $0x20] sm:$0xff] }
 0x49c   : > { %v440_v20 = vmul.f32 1.442695, %v439_v19 }
 0x49e   : > { %1471 = vpow2.f32 %v440_v20  ;;  %v708_v20 = vld [vmem:[%s2083_s4 + $0x18] sm:$0xff] }
 0x4a1   : > { %v509_v21 = vpop.xlane.xlu1 %508 }
 0x4a2   : > { %1473 = vrcp.f32 %v509_v21 }
 0x4a4   : > { %v1472_v22 = vpop.eup %1471 }
 0x4a5   : > { %v442_v23 = vsel %vm346_vm5, %v1472_v22, 0.0 }
 0x4a6   : > { %443 = vadd.xlane.f32.xlu1 %v442_v23 }
 0x4a8   : > { %v1474_v24 = vpop.eup %1473 }
 0x4a9   : > { %v511_v25 = vmul.f32 %v1474_v24, %v1468_v11 }
 0x4ab   : > { %1348 = vmatmul.msk.f32.vlgmr.msra.gmra.mxu3 %vm346_vm5, %v511_v25  ;;  %v674_v25 = vperm.slane %v1701_v26, 4 }
 0x4bf   : > { %447 = vrot.lane.b32.xlu1 %v1706_v34, %s1579_s29 }
 0x50a   : > { %v574_v27 = vpop.xlane.xlu1 %573 }
 0x519   : > { %v444_v28 = vpop.xlane.xlu1 %443 }
 0x51a   : > { %1475 = vrcp.f32 %v444_v28 }
 0x51b   : > { %1477 = vrcp.f32 %v574_v27 }
 0x520   : > { %v1476_v29 = vpop.eup %1475 }
 0x521   : > { %v446_v31 = vmul.f32 %v1476_v29, %v1472_v22  ;;  %v1478_v35 = vpop.eup %1477  ;;  %v672_v22 = vperm.slane %v1701_v26, 3  ;;  %v707_v29 = vld [vmem:[%s2083_s4 + $0x10] sm:$0xff] }
 0x522   : > { %v576_v36 = vmul.f32 %v1478_v35, %v1470_v16  ;;  %v710_v16 = vld [vmem:[%s2083_s4 + $0x28] sm:$0xff] }
 0x52e   : > { %v535_v30 = vpop.f32.mrf.mxu3 }
 0x52f   : > { %608 = vrot.lane.b32.xlu0 %v535_v30, %s2087_s8  ;;  %v706_v30 = vld [vmem:[%s2083_s4 + $0x8] sm:$0xff]  ;;  %s267_s8 = sand.u32 1, %s1557_s25  }
 0x531   : > { %v448_v32 = vpop.permute.xlu1 %447 }
 0x532   : > { %468 = vmatpush.msra.mxu2 %v448_v32  ;;  %v680_v32 = vperm.slane %v1701_v26, 6 }
 0x533   : > { %1345 = vmatmul.msk.f32.vlgmr.msra.gmra.mxu2 %vm346_vm5, %v446_v31  ;;  %v705_v31 = vld [vmem:[%s2083_s4] sm:$0xff] }
 0x534   : > { %598 = vmatpush.msrb.mxu2 %v578_v33 }
 0x53b   : > { %1351 = vmatmul.msk.f32.vlgmr.msrb.gmra.mxu2 %vm346_vm5, %v576_v36 }
 0x5a1   : > { %v609_v44 = vpop.permute.xlu0 %608 }
 0x5b6   : > { %v470_v34 = vpop.f32.mrf.mxu2 }
 0x5b7   : > { %604 = vrot.lane.b32.xlu1 %v470_v34, %s2093_s9  ;;  %v742_v34 = vperm.slane %v1701_v26, 5  ;;  %v1358_v26 = vld [vmem:[%s2080_s1 + $0x38] sm:$0xff]  ;;  %s1337_s9 = sshll.u32 %s267_s8, 3 }
 0x5b8   : > { %792 = vmatpush.msra.mxu2 %v1358_v26 }
 0x5be   : > { %v600_v37 = vpop.f32.mrf.mxu2 }
 0x5bf   : > { %612 = vrot.lane.b32.xlu1 %v600_v37, %s2095_s13  ;;  %s1523_s13 = scalar_lea.hbm %s2086_s7, 16 }
 0x629   : > { %v605_v42 = vpop.permute.xlu1 %604 }
 0x62a   : > { %v615_v43 = vsel %vm346_vm5, %v1745_v4, %v605_v42  ;;  %v717_v4 = vld [vmem:[%s2083_s4 + $0x60] sm:$0xff] }
 0x62b   : > { %v617_v45 = vsel %vm616_vm7, %v615_v43, %v609_v44  ;;  %724 = vmatpush.msra.mxu0 %v717_v4 }
 0x62d   : > { %725 = vmatpush.msra.mxu0 %v716_v6 }
 0x62f   : > { %726 = vmatpush.msra.mxu0 %v715_v7 }
 0x631   : > { %v613_v47 = vpop.permute.xlu1 %612  ;;  %727 = vmatpush.msra.mxu0 %v714_v9 }
 0x632   : > { %v619_v48 = vsel %vm618_vm8, %v617_v45, %v613_v47  ;;  %v1357_v47 = vld [vmem:[%s2080_s1 + $0x30] sm:$0xff] }
 0x633   : > { %1352 = vmatmul.msk.f32.vlgmr.msra.gmra.mxu1 %vm282_vm0, %v619_v48  ;;  %728 = vmatpush.msra.mxu0 %v713_v10  ;;  %v1356_v48 = vld [vmem:[%s2080_s1 + $0x28] sm:$0xff] }
 0x634   : > { %793 = vmatpush.msra.mxu2 %v1357_v47 }
 0x635   : > { %729 = vmatpush.msra.mxu0 %v712_v12 }
 0x636   : > { %794 = vmatpush.msra.mxu2 %v1356_v48 }
 0x637   : > { %730 = vmatpush.msra.mxu0 %v711_v14 }
 0x639   : > { %731 = vmatpush.msra.mxu0 %v710_v16 }
 0x63b   : > { %732 = vmatpush.msra.mxu0 %v709_v18 }
 0x63d   : > { %733 = vmatpush.msra.mxu0 %v708_v20 }
 0x63f   : > { %734 = vmatpush.msra.mxu0 %v707_v29 }
 0x641   : > { %735 = vmatpush.msra.mxu0 %v706_v30 }
 0x643   : > { %736 = vmatpush.msra.mxu0 %v705_v31 }
 0x6b0   : > { %v644_v50 = vpop.f32.mrf.mxu1 }
 0x6b1   : > { %v647_v51 = vadd.f32 %v644_v50, %v1676_v0  ;;  %v678_v0 = vld [vmem:[%s2082_s3 + $0x10] sm:$0xff] }
 0x6b2   : > { %697 = vmatpush.msrb.mxu1 %v678_v0 }
 0x6b3   : > { %v1781_v52 = vadd.f32 %v648_v49, %v647_v51  ;;  %v1355_v49 = vld [vmem:[%s2080_s1 + $0x20] sm:$0xff] }
 0x6b4   : > { %698 = vmatpush.msrb.mxu1 %v677_v60  ;;  %795 = vmatpush.msra.mxu2 %v1355_v49 }
 0x6b5   : > { %v650_v53 = vsel %vm282_vm0, %v1781_v52, 0.0 }
 0x6b6   : > { %651 = vadd.xlane.f32.xlu2 %v650_v53  ;;  %699 = vmatpush.msrb.mxu1 %v676_v61 }
 0x729   : > { %v652_v54 = vpop.xlane.xlu2 %651 }
 0x72a   : > { %v653_v55 = vmul.f32 %v652_v54, %v1680_v8 }
 0x72c   : > { %v654_v56 = vsub.f32 %v1781_v52, %v653_v55 }
 0x72e   : > { %v655_v57 = vmul.f32 %v654_v56, %v654_v56 }
 0x730   : > { %v656_v58 = vsel %vm282_vm0, %v655_v57, 0.0  ;;  %v1878_v57 = vld [vmem:[%s2084_s5 + $0x8] sm:$0xff] }
 0x731   : > { %657 = vadd.xlane.f32.xlu0 %v656_v58  ;;  %v768_v0 = vperm.slane %v1878_v57, 0  ;;  %v770_v62 = vperm.slane %v1878_v57, 1 }
 0x7a4   : > { %v658_v2 = vpop.xlane.xlu0 %657 }
 0x7a5   : > { %v659_v3 = vmul.f32 %v658_v2, %v1680_v8 }
 0x7a7   : > { %v660_v5 = vadd.f32 1e-05, %v659_v3 }
 0x7a9   : > { %1479 = vrsqrt.f32 %v660_v5  ;;  %vm667_vm10 = vweird.f32 %v660_v5 }
 0x7af   : > { %v1480_v11 = vpop.eup %1479 }
 0x7b0   : > { %v662_v13 = vmul.f32 %v1480_v11, %v660_v5  ;;  %vm668_vm9 = vweird.f32 %v1480_v11 }
 0x7b1   : > { %vm669_vm11 = vmor %vm667_vm10, %vm668_vm9 }
 0x7b2   : > { %v663_v15 = vmul.f32 %v1480_v11, %v662_v13 }
 0x7b4   : > { %v664_v17 = vmul.f32 0.5, %v663_v15 }
 0x7b6   : > { %v665_v19 = vsub.f32 1.5, %v664_v17 }
 0x7b8   : > { %v666_v21 = vmul.f32 %v1480_v11, %v665_v19 }
 0x7ba   : > { %v670_v23 = vsel %vm669_vm11, %v1480_v11, %v666_v21 }
 0x7bb   : > { %v671_v24 = vmul.f32 %v670_v23, %v654_v56 }
 0x7bd   : > { %v673_v27 = vmul.f32 %v672_v22, %v671_v24 }
 0x7bf   : > { %v675_v28 = vadd.f32 %v674_v25, %v673_v27 }
 0x7c1   : > { %1353 = vmatmul.msk.f32.vlgmr.msrb.gmra.mxu1 %vm282_vm0, %v675_v28 }
 0x83e   : > { %v701_v33 = vpop.f32.mrf.mxu1 }
 0x83f   : > { %v702_v35 = vadd.f32 %v701_v33, %v680_v32 }
 0x841   : > { %v704_v36 = vmax.f32 %v702_v35, 0.0 }
 0x843   : > { %737 = vmatmul.f32.vlgmr.msra.gmra.mxu0 %v704_v36 }
 0x8c0   : > { %v738_v37 = vpop.f32.mrf.mxu0 }
 0x8c1   : > { %v741_v38 = vadd.f32 %v738_v37, %v1781_v52 }
 0x8c3   : > { %v1855_v39 = vadd.f32 %v742_v34, %v741_v38 }
 0x8c5   : > { %v746_v40 = vsel %vm282_vm0, %v1855_v39, 0.0 }
 0x8c6   : > { %747 = vadd.xlane.f32.xlu1 %v746_v40 }
 0x939   : > { %v748_v41 = vpop.xlane.xlu1 %747 }
 0x93a   : > { %v749_v42 = vmul.f32 %v748_v41, %v1680_v8 }
 0x93c   : > { %v750_v43 = vsub.f32 %v1855_v39, %v749_v42 }
 0x93e   : > { %v751_v44 = vmul.f32 %v750_v43, %v750_v43 }
 0x940   : > { %v752_v45 = vsel %vm282_vm0, %v751_v44, 0.0 }
 0x941   : > { %753 = vadd.xlane.f32.xlu2 %v752_v45 }
 0x9b4   : > { %v754_v50 = vpop.xlane.xlu2 %753 }
 0x9b5   : > { %v755_v51 = vmul.f32 %v754_v50, %v1680_v8 }
 0x9b7   : > { %v756_v52 = vadd.f32 1e-05, %v755_v51 }
 0x9b9   : > { %1481 = vrsqrt.f32 %v756_v52  ;;  %vm763_vm13 = vweird.f32 %v756_v52 }
 0x9bf   : > { %v1482_v53 = vpop.eup %1481 }
 0x9c0   : > { %v758_v54 = vmul.f32 %v1482_v53, %v756_v52  ;;  %vm764_vm12 = vweird.f32 %v1482_v53 }
 0x9c1   : > { %vm765_vm14 = vmor %vm763_vm13, %vm764_vm12 }
 0x9c2   : > { %v759_v55 = vmul.f32 %v1482_v53, %v758_v54 }
 0x9c4   : > { %v760_v56 = vmul.f32 0.5, %v759_v55 }
 0x9c6   : > { %v761_v58 = vsub.f32 1.5, %v760_v56 }
 0x9c8   : > { %v762_v59 = vmul.f32 %v1482_v53, %v761_v58 }
 0x9ca   : > { %v766_v60 = vsel %vm765_vm14, %v1482_v53, %v762_v59 }
 0x9cb   : > { %v767_v61 = vmul.f32 %v766_v60, %v750_v43 }
 0x9cd   : > { %v769_v63 = vmul.f32 %v768_v0, %v767_v61 }
 0x9cf   : > { %v771_v1 = vadd.f32 %v770_v62, %v769_v63  ;;  %v1375_v62 = vld [vmem:[%s2081_s2 + $0x38] sm:$0xff]  ;;  %v1374_v63 = vld [vmem:[%s2081_s2 + $0x30] sm:$0xff] }
 0x9d1   : > { %1359 = vmatmul.msk.f32.vlgmr.msra.gmra.mxu2 %vm282_vm0, %v771_v1  ;;  %v1373_v1 = vld [vmem:[%s2081_s2 + $0x28] sm:$0xff] }
 0xa54   : > { %v1883_v2 = vpop.f32.mrf.mxu2 }
 0xa55   : > { %864 = vrot.lane.b32.xlu2 %v1883_v2, %s1572_s18  ;;  %866 = vrot.lane.b32.xlu1 %v1883_v2, %s1568_s14  ;;  %s2099_s14 = smov 80   ;;  %s2101_s18 = smov 72  }
 0xa56   : > { %801 = vrot.lane.b32.xlu0 %v1883_v2, %s1570_s16  ;;  %s2100_s16 = smov 64  }
 0xa5d   : > { %903 = vrot.lane.b32.xlu2 %v1883_v2, %s1579_s29  ;;  %s2102_s29 = smov 104  }
 0xaaf   : > { %v865_v3 = vpop.permute.xlu2 %864 }
 0xab7   : > { %v904_v6 = vpop.permute.xlu2 %903 }
 0xac7   : > { %v867_v4 = vpop.permute.xlu1 %866 }
 0xac8   : > { %v802_v5 = vpop.permute.xlu0 %801  ;;  %1363 = vmatpush.xpose.msk.msrb.mxu2 %vm346_vm5, %v867_v4  ;;  %v1372_v4 = vld [vmem:[%s2081_s2 + $0x20] sm:$0xff] }
 0xac9   : > { %1360 = vmatpush.xpose.msk.msra.mxu1 %vm346_vm5, %v802_v5 }
 0xacb   : > { %1364 = vmatmul.msk.f32.vlgmr.msrb.gmra.mxu2 %vm346_vm5, %v865_v3 }
 0xacc   : > { %1361 = vmatmul.msk.f32.vlgmr.msra.gmra.mxu1 %vm346_vm5, %v1883_v2 }
 0xacd   : > { %924 = vmatpush.msrb.mxu1 %v904_v6 }
 0xb49   : > { %v824_v7 = vpop.f32.mrf.mxu1 }
 0xb4a   : > { %v825_v9 = vadd.f32 %v824_v7, %v1729_v46 }
 0xb4c   : > { %v827_v10 = vsel %vm346_vm5, %v825_v9, -inf }
 0xb4d   : > { %828 = vmax.xlane.f32.xlu0 %v827_v10 }
 0xb4e   : > { %v889_v11 = vpop.f32.mrf.mxu2 }
 0xb4f   : > { %v890_v12 = vadd.f32 %v889_v11, %v1729_v46 }
 0xb51   : > { %v892_v13 = vsel %vm346_vm5, %v890_v12, -inf }
 0xb52   : > { %893 = vmax.xlane.f32.xlu1 %v892_v13 }
 0xb61   : > { %931 = vrot.lane.b32.xlu0 %v1883_v2, %s2099_s14  ;;  %s2107_s14 = smov 16  }
 0xb6b   : > { %838 = vrot.lane.b32.xlu1 %v1883_v2, %s2100_s16  ;;  %s2108_s16 = smov 24  }
 0xb73   : > { %996 = vrot.lane.b32.xlu1 %v1883_v2, %s2101_s18 }
 0xbc0   : > { %v829_v14 = vpop.xlane.xlu0 %828 }
 0xbc1   : > { %v830_v15 = vsub.f32 %v825_v9, %v829_v14 }
 0xbc3   : > { %v831_v16 = vmul.f32 1.442695, %v830_v15 }
 0xbc5   : > { %1483 = vpow2.f32 %v831_v16  ;;  %v894_v17 = vpop.xlane.xlu1 %893 }
 0xbc6   : > { %v895_v18 = vsub.f32 %v890_v12, %v894_v17  ;;  %v1103_v12 = vperm.slane %v1878_v57, 2 }
 0xbc8   : > { %v896_v19 = vmul.f32 1.442695, %v895_v18 }
 0xbca   : > { %1485 = vpow2.f32 %v896_v19 }
 0xbcb   : > { %v1484_v20 = vpop.eup %1483 }
 0xbcc   : > { %v833_v21 = vsel %vm346_vm5, %v1484_v20, 0.0 }
 0xbcd   : > { %834 = vadd.xlane.f32.xlu2 %v833_v21 }
 0xbd0   : > { %v1486_v22 = vpop.eup %1485 }
 0xbd1   : > { %v898_v23 = vsel %vm346_vm5, %v1486_v22, 0.0 }
 0xbd2   : > { %899 = vadd.xlane.f32.xlu0 %v898_v23  ;;  %v1378_v23 = vld [vmem:[%s2082_s3 + $0x28] sm:$0xff] }
 0xbd3   : > { %v932_v25 = vpop.permute.xlu0 %931 }
 0xbdd   : > { %v839_v24 = vpop.permute.xlu1 %838 }
 0xbde   : > { %859 = vmatpush.msrb.mxu3 %v839_v24  ;;  %v1377_v24 = vld [vmem:[%s2082_s3 + $0x20] sm:$0xff] }
 0xbe0   : > { %1366 = vmatpush.xpose.msk.msra.mxu3 %vm346_vm5, %v932_v25  ;;  %v1397_v25 = vld [vmem:[%s2083_s4 + $0xf8] sm:$0xff] }
 0xbe5   : > { %994 = vrot.lane.b32.xlu2 %v1883_v2, %s2102_s29  ;;  %v997_v27 = vpop.permute.xlu1 %996 }
 0xbe6   : > { %1369 = vmatpush.xpose.msk.msra.mxu1 %vm346_vm5, %v997_v27  ;;  %929 = vrot.lane.b32.xlu0 %v1883_v2, %s2103_s15  ;;  %v1396_v27 = vld [vmem:[%s2083_s4 + $0xf0] sm:$0xff]  ;;  %s269_s15 = scalar_lea.vmem [#allocation2], %s1337_s9 }
 0xc40   : > { %v835_v28 = vpop.xlane.xlu2 %834 }
 0xc41   : > { %1487 = vrcp.f32 %v835_v28  ;;  %v1395_v28 = vld [vmem:[%s2083_s4 + $0xe8] sm:$0xff] }
 0xc45   : > { %v900_v29 = vpop.xlane.xlu0 %899 }
 0xc46   : > { %1489 = vrcp.f32 %v900_v29 }
 0xc47   : > { %v1488_v30 = vpop.eup %1487 }
 0xc48   : > { %v837_v31 = vmul.f32 %v1488_v30, %v1484_v20  ;;  %v995_v35 = vpop.permute.xlu2 %994 }
 0xc4a   : > { %1362 = vmatmul.msk.f32.vlgmr.msrb.gmra.mxu3 %vm346_vm5, %v837_v31  ;;  %v1394_v31 = vld [vmem:[%s2083_s4 + $0xe0] sm:$0xff] }
 0xc4c   : > { %v1490_v32 = vpop.eup %1489 }
 0xc4d   : > { %v902_v33 = vmul.f32 %v1490_v32, %v1486_v22  ;;  %v1380_v22 = vld [vmem:[%s2082_s3 + $0x38] sm:$0xff] }
 0xc4f   : > { %1365 = vmatmul.msk.f32.vlgmr.msrb.gmra.mxu1 %vm346_vm5, %v902_v33  ;;  %v1393_v33 = vld [vmem:[%s2083_s4 + $0xd8] sm:$0xff] }
 0xc50   : > { %1152 = vmatpush.msrb.mxu1 %v1380_v22 }
 0xc57   : > { %1370 = vmatmul.msk.f32.vlgmr.msra.gmra.mxu1 %vm346_vm5, %v995_v35  ;;  %v1392_v35 = vld [vmem:[%s2083_s4 + $0xd0] sm:$0xff] }
 0xc58   : > { %v930_v36 = vpop.permute.xlu0 %929 }
 0xc59   : > { %1367 = vmatmul.msk.f32.vlgmr.msra.gmra.mxu3 %vm346_vm5, %v930_v36  ;;  %v1391_v36 = vld [vmem:[%s2083_s4 + $0xc8] sm:$0xff] }
 0xccc   : > { %v926_v34 = vpop.f32.mrf.mxu1 }
 0xccd   : > { %v861_v37 = vpop.f32.mrf.mxu3 }
 0xcd4   : > { %v1019_v38 = vpop.f32.mrf.mxu1 }
 0xcd5   : > { %v1020_v40 = vadd.f32 %v1019_v38, %v1729_v46  ;;  %v1389_v38 = vld [vmem:[%s2083_s4 + $0xb8] sm:$0xff] }
 0xcd7   : > { %v1022_v41 = vsel %vm346_vm5, %v1020_v40, -inf }
 0xcd8   : > { %1023 = vmax.xlane.f32.xlu1 %v1022_v41  ;;  %v1388_v41 = vld [vmem:[%s2083_s4 + $0xb0] sm:$0xff] }
 0xcdc   : > { %v954_v42 = vpop.f32.mrf.mxu3 }
 0xcdd   : > { %v955_v43 = vadd.f32 %v954_v42, %v1729_v46 }
 0xcdf   : > { %v957_v44 = vsel %vm346_vm5, %v955_v43, -inf }
 0xce0   : > { %958 = vmax.xlane.f32.xlu0 %v957_v44 }
 0xcf1   : > { %968 = vrot.lane.b32.xlu1 %v1883_v2, %s2104_s19  ;;  %s1271_s19 = sshll.u32 %s269_s15, 4  ;;  %s1272_s19 = int_to_ptr.vmem [resolvable:$true] %s1271_s19 }
 0xd4b   : > { %v1024_v45 = vpop.xlane.xlu1 %1023 }
 0xd4c   : > { %v1025_v26 = vsub.f32 %v1020_v40, %v1024_v45  ;;  %v1386_v45 = vld [vmem:[%s2083_s4 + $0xa0] sm:$0xff] }
 0xd4e   : > { %v1026_v47 = vmul.f32 1.442695, %v1025_v26 }
 0xd50   : > { %1491 = vpow2.f32 %v1026_v47  ;;  %v1385_v47 = vld [vmem:[%s2083_s4 + $0x98] sm:$0xff] }
 0xd53   : > { %v959_v48 = vpop.xlane.xlu0 %958 }
 0xd54   : > { %v960_v49 = vsub.f32 %v955_v43, %v959_v48  ;;  %v1387_v43 = vld [vmem:[%s2083_s4 + $0xa8] sm:$0xff] }
 0xd56   : > { %v1492_v50 = vpop.eup %1491  ;;  %v961_v51 = vmul.f32 1.442695, %v960_v49  ;;  %v1127_v49 = vperm.slane %v1878_v57, 3 }
 0xd57   : > { %v1028_v52 = vsel %vm346_vm5, %v1492_v50, 0.0 }
 0xd58   : > { %1493 = vpow2.f32 %v961_v51  ;;  %1029 = vadd.xlane.f32.xlu0 %v1028_v52  ;;  %v1129_v52 = vperm.slane %v1878_v57, 4 }
 0xd5e   : > { %v1494_v53 = vpop.eup %1493 }
 0xd5f   : > { %v963_v46 = vsel %vm346_vm5, %v1494_v53, 0.0 }
 0xd60   : > { %964 = vadd.xlane.f32.xlu2 %v963_v46 }
 0xd63   : > { %v969_v54 = vpop.permute.xlu1 %968 }
 0xd64   : > { %989 = vmatpush.msra.mxu2 %v969_v54  ;;  %v1384_v54 = vld [vmem:[%s2083_s4 + $0x90] sm:$0xff] }
 0xd66   : > { %1094 = vmatpush.msrb.mxu2 %v1375_v62 }
 0xd68   : > { %1095 = vmatpush.msrb.mxu2 %v1374_v63 }
 0xd6a   : > { %1096 = vmatpush.msrb.mxu2 %v1373_v1 }
 0xd6c   : > { %1060 = vrot.lane.b32.xlu0 %v926_v34, %s2105_s20  ;;  %1097 = vmatpush.msrb.mxu2 %v1372_v4  ;;  %v1390_v34 = vld [vmem:[%s2083_s4 + $0xc0] sm:$0xff] }
 0xd78   : > { %1033 = vrot.lane.b32.xlu2 %v1883_v2, %s2106_s21  ;;  %s1259_s21 = scalar_lea.sflag [#allocation3], %s267_s8 }
 0xdcb   : > { %v1030_v55 = vpop.xlane.xlu0 %1029 }
 0xdcc   : > { %1495 = vrcp.f32 %v1030_v55  ;;  %v1383_v55 = vld [vmem:[%s2083_s4 + $0x88] sm:$0xff] }
 0xdd2   : > { %v1496_v58 = vpop.eup %1495 }
 0xdd3   : > { %v965_v56 = vpop.xlane.xlu2 %964  ;;  %v1032_v0 = vmul.f32 %v1496_v58, %v1492_v50  ;;  %v1136_v58 = vperm.slane %v1878_v57, 6 }
 0xdd4   : > { %1497 = vrcp.f32 %v965_v56  ;;  %v1382_v56 = vld [vmem:[%s2083_s4 + $0x80] sm:$0xff] }
 0xdda   : > { %v1498_v59 = vpop.eup %1497 }
 0xddb   : > { %v967_v60 = vmul.f32 %v1498_v59, %v1494_v53  ;;  %v1034_v61 = vpop.permute.xlu2 %1033 }
 0xddc   : > { %1054 = vmatpush.msrb.mxu3 %v1034_v61  ;;  %v1199_v61 = vperm.slane %v1878_v57, 5  ;;  %v1231_v57 = vld [vmem:[%s2085_s6 + $0x10] sm:$0xff] }
 0xddd   : > { %1368 = vmatmul.msk.f32.vlgmr.msra.gmra.mxu2 %vm346_vm5, %v967_v60  ;;  %1371 = vmatmul.msk.f32.vlgmr.msrb.gmra.mxu3 %vm346_vm5, %v1032_v0 }
 0xdde   : > { %v1061_v5 = vpop.permute.xlu0 %1060  ;;  %1178 = vmatpush.msra.mxu3 %v1397_v25 }
 0xddf   : > { %v1071_v6 = vsel %vm346_vm5, %v861_v37, %v1061_v5 }
 0xde0   : > { %1179 = vmatpush.msra.mxu3 %v1396_v27 }
 0xde2   : > { %1180 = vmatpush.msra.mxu3 %v1395_v28 }
 0xde4   : > { %1181 = vmatpush.msra.mxu3 %v1394_v31 }
 0xde6   : > { %1182 = vmatpush.msra.mxu3 %v1393_v33 }
 0xde8   : > { %1183 = vmatpush.msra.mxu3 %v1392_v35 }
 0xdea   : > { %1184 = vmatpush.msra.mxu3 %v1391_v36 }
 0xdec   : > { %1185 = vmatpush.msra.mxu3 %v1390_v34 }
 0xdee   : > { %1186 = vmatpush.msra.mxu3 %v1389_v38 }
 0xdf0   : > { %1187 = vmatpush.msra.mxu3 %v1388_v41 }
 0xdf2   : > { %1188 = vmatpush.msra.mxu3 %v1387_v43 }
 0xdf4   : > { %1189 = vmatpush.msra.mxu3 %v1386_v45 }
 0xdf6   : > { %1190 = vmatpush.msra.mxu3 %v1385_v47 }
 0xdf8   : > { %1191 = vmatpush.msra.mxu3 %v1384_v54 }
 0xdfa   : > { %1192 = vmatpush.msra.mxu3 %v1383_v55 }
 0xdfc   : > { %1193 = vmatpush.msra.mxu3 %v1382_v56 }
 0xe60   : > { %v991_v2 = vpop.f32.mrf.mxu2  ;;  %v1056_v3 = vpop.f32.mrf.mxu3 }
 0xe61   : > { %1064 = vrot.lane.b32.xlu0 %v991_v2, %s2107_s14  ;;  %1068 = vrot.lane.b32.xlu1 %v1056_v3, %s2108_s16  ;;  %s1401_s14 = sshll.u32 %s1644_s28, 3 }
 0xe62   : > { %s1269_s29 = scalar_lea.hbm %s2086_s7, %s1401_s14 }
 0xe63   : > { %s1273_s20 = sshll.u32 %s1269_s29, 4  ;;  %s1274_s20 = int_to_ptr.hbm [resolvable:$true] %s1273_s20 }
 0xe64   : > { %s1517_s22 = sshra.s32 %s1274_s20, 4  ;;  %s1518_s22 = int_to_ptr.hbm [resolvable:$true] %s1517_s22 }
 0xe65   : > { %s1519_s23 = scalar_lea.hbm %s1518_s22, 8  ;;  %p1524_p0 = scmp.lt.s32.totalorder %s1518_s22, %s2086_s7 }
 0xe66   : > { %p1520_p11 = scmp.ne.s32.totalorder %s1518_s22, %s1519_s23  ;;  %p1525_p1 = scmp.lt.s32.totalorder %s1523_s13, %s1519_s23 }
 0xe68   : > { %p1521_p12 = pnand %p1520_p11, %p1661_p5  ;;  %p1526_p2 = por %p1525_p1, %p1524_p0 }
 0xe6a   : > { %p1522_p13 = pneg %p1521_p12 }
 0xe6c   : > { %p1527_p3 = pnand %p1526_p2, %p1522_p13 }
 0xed3   : > { %v1069_v7 = vpop.permute.xlu1 %1068  ;;  %v1065_v9 = vpop.permute.xlu0 %1064 }
 0xed4   : > { %v1072_v10 = vsel %vm616_vm7, %v1071_v6, %v1065_v9  ;;  %v1232_v9 = vld [vmem:[%s2085_s6 + $0x18] sm:$0xff] }
 0xed5   : > { %v1073_v11 = vsel %vm618_vm8, %v1072_v10, %v1069_v7  ;;  %1249 = vmatpush.msrb.mxu0 %v1232_v9  ;;  %v1230_v10 = vld [vmem:[%s2085_s6 + $0x8] sm:$0xff] }
 0xed6   : > { %1376 = vmatmul.msk.f32.vlgmr.msrb.gmra.mxu2 %vm282_vm0, %v1073_v11  ;;  %v1229_v11 = vld [vmem:[%s2085_s6] sm:$0xff] }
 0xed7   : > { %1250 = vmatpush.msrb.mxu0 %v1231_v57 }
 0xed9   : > { %1251 = vmatpush.msrb.mxu0 %v1230_v10 }
 0xedb   : > { %1252 = vmatpush.msrb.mxu0 %v1229_v11 }
 0xf59   : > { %v1099_v13 = vpop.f32.mrf.mxu2 }
 0xf5a   : > { %v1102_v14 = vadd.f32 %v1099_v13, %v1855_v39  ;;  %v1379_v39 = vld [vmem:[%s2082_s3 + $0x30] sm:$0xff] }
 0xf5b   : > { %1153 = vmatpush.msrb.mxu1 %v1379_v39 }
 0xf5c   : > { %v1953_v15 = vadd.f32 %v1103_v12, %v1102_v14 }
 0xf5d   : > { %1154 = vmatpush.msrb.mxu1 %v1378_v23 }
 0xf5e   : > { %v1105_v16 = vsel %vm282_vm0, %v1953_v15, 0.0 }
 0xf5f   : > { %1106 = vadd.xlane.f32.xlu2 %v1105_v16  ;;  %1155 = vmatpush.msrb.mxu1 %v1377_v24 }
 0xfd2   : > { %v1107_v17 = vpop.xlane.xlu2 %1106 }
 0xfd3   : > { %v1108_v18 = vmul.f32 %v1107_v17, %v1680_v8 }
 0xfd5   : > { %v1109_v19 = vsub.f32 %v1953_v15, %v1108_v18 }
 0xfd7   : > { %v1110_v20 = vmul.f32 %v1109_v19, %v1109_v19 }
 0xfd9   : > { %v1111_v21 = vsel %vm282_vm0, %v1110_v20, 0.0 }
 0xfda   : > { %1112 = vadd.xlane.f32.xlu0 %v1111_v21 }
0x104d   : > { %v1113_v29 = vpop.xlane.xlu0 %1112 }
0x104e   : > { %v1114_v30 = vmul.f32 %v1113_v29, %v1680_v8 }
0x1050   : > { %v1115_v32 = vadd.f32 1e-05, %v1114_v30 }
0x1052   : > { %1499 = vrsqrt.f32 %v1115_v32  ;;  %vm1122_vm1 = vweird.f32 %v1115_v32 }
0x1058   : > { %v1500_v37 = vpop.eup %1499 }
0x1059   : > { %v1117_v40 = vmul.f32 %v1500_v37, %v1115_v32  ;;  %vm1123_vm15 = vweird.f32 %v1500_v37 }
0x105a   : > { %vm1124_vm2 = vmor %vm1122_vm1, %vm1123_vm15 }
0x105b   : > { %v1118_v42 = vmul.f32 %v1500_v37, %v1117_v40 }
0x105d   : > { %v1119_v44 = vmul.f32 0.5, %v1118_v42 }
0x105f   : > { %v1120_v26 = vsub.f32 1.5, %v1119_v44 }
0x1061   : > { %v1121_v48 = vmul.f32 %v1500_v37, %v1120_v26 }
0x1063   : > { %v1125_v50 = vsel %vm1124_vm2, %v1500_v37, %v1121_v48 }
0x1064   : > { %v1126_v51 = vmul.f32 %v1125_v50, %v1109_v19  ;;  %v1398_v19 = vld [vmem:[%s2084_s5 + $0x10] sm:$0xff] }
0x1065   : > { %v1225_v22 = vperm.slane %v1398_v19, 0  ;;  %v1227_v23 = vperm.slane %v1398_v19, 1  ;;  %v1233_v27 = vperm.slane %v1398_v19, 2 }
0x1066   : > { %v1128_v53 = vmul.f32 %v1127_v49, %v1126_v51 }
0x1068   : > { %v1130_v46 = vadd.f32 %v1129_v52, %v1128_v53 }
0x106a   : > { %1381 = vmatmul.msk.f32.vlgmr.msrb.gmra.mxu1 %vm282_vm0, %v1130_v46 }
0x10e7   : > { %v1157_v59 = vpop.f32.mrf.mxu1 }
0x10e8   : > { %v1158_v0 = vadd.f32 %v1157_v59, %v1136_v58 }
0x10ea   : > { %v1160_v60 = vmax.f32 %v1158_v0, 0.0 }
0x10ec   : > { %1194 = vmatmul.f32.vlgmr.msra.gmra.mxu3 %v1160_v60 }
0x116f   : > { %v1195_v62 = vpop.f32.mrf.mxu3 }
0x1170   : > { %v1198_v63 = vadd.f32 %v1195_v62, %v1953_v15 }
0x1172   : > { %v1200_v1 = vadd.f32 %v1199_v61, %v1198_v63 }
0x1174   : > { %v1203_v2 = vsel %vm282_vm0, %v1200_v1, 0.0 }
0x1175   : > { %1204 = vadd.xlane.f32.xlu1 %v1203_v2 }
0x11e8   : > { %v1205_v3 = vpop.xlane.xlu1 %1204 }
0x11e9   : > { %v1206_v4 = vmul.f32 %v1205_v3, %v1680_v8 }
0x11eb   : > { %v1207_v5 = vsub.f32 %v1200_v1, %v1206_v4 }
0x11ed   : > { %v1208_v6 = vmul.f32 %v1207_v5, %v1207_v5 }
0x11ef   : > { %v1209_v7 = vsel %vm282_vm0, %v1208_v6, 0.0 }
0x11f0   : > { %1210 = vadd.xlane.f32.xlu2 %v1209_v7 }
0x1263   : > { %v1211_v12 = vpop.xlane.xlu2 %1210 }
0x1264   : > { %v1212_v13 = vmul.f32 %v1211_v12, %v1680_v8 }
0x1266   : > { %v1213_v14 = vadd.f32 1e-05, %v1212_v13 }
0x1268   : > { %1501 = vrsqrt.f32 %v1213_v14  ;;  %vm1220_vm4 = vweird.f32 %v1213_v14 }
0x126e   : > { %v1502_v15 = vpop.eup %1501 }
0x126f   : > { %v1215_v16 = vmul.f32 %v1502_v15, %v1213_v14  ;;  %vm1221_vm3 = vweird.f32 %v1502_v15 }
0x1270   : > { %vm1222_vm5 = vmor %vm1220_vm4, %vm1221_vm3 }
0x1271   : > { %v1216_v17 = vmul.f32 %v1502_v15, %v1215_v16 }
0x1273   : > { %v1217_v18 = vmul.f32 0.5, %v1216_v17 }
0x1275   : > { %v1218_v20 = vsub.f32 1.5, %v1217_v18 }
0x1277   : > { %v1219_v21 = vmul.f32 %v1502_v15, %v1218_v20 }
0x1279   : > { %v1223_v39 = vsel %vm1222_vm5, %v1502_v15, %v1219_v21 }
0x127a   : > { %v1224_v8 = vmul.f32 %v1223_v39, %v1207_v5 }
0x127c   : > { %v1226_v24 = vmul.f32 %v1225_v22, %v1224_v8 }
0x127e   : > { %v1228_v25 = vadd.f32 %v1227_v23, %v1226_v24 }
0x1280   : > { %1399 = vmatmul.msk.f32.vlgmr.msrb.gmra.mxu0 %vm282_vm0, %v1228_v25 }
0x12fd   : > { %v1254_v28 = vpop.f32.mrf.mxu0 }
0x12fe   : > { %v1255_v29 = vadd.f32 %v1254_v28, %v1233_v27 }
0x1300   : > { %1257 = vst [vmem:[%s269_s15] sm:$0xff] %v1255_v29 }
0x1301   : > { %1530 = shalt.err (!%p1527_p3)
}
0x1302   : > { %1404 = dma.vmem_to_hbm [thread:$0]  (%p1661_p5), %s1272_s19, 128, %s1274_s20, %s1259_s21  }
0x1303 PF: > { %p1410_p4 = scmp.ge.s32.totalorder %s1565_s27, 2  ;;  %s1285_s8 = sand.u32 1, %s1553_s24  }
0x1304   : > { %s1286_s16 = scalar_lea.sflag [#allocation3], %s1285_s8 }
0x1305   : > { %p1407_p7 = pnand %p1410_p4, %p1665_p6 }
0x1307   : > { %p1408_p8 = pneg %p1407_p7 }
0x1309   : > { %1548 = dma.done.wait (%p1408_p8), %s1286_s16, 128  }
0x130a   : > { %1550 = vsyncadd (%p1408_p8), %s1286_s16, 4294967168  ;;  %p17_p9 = scmp.ge.s32.totalorder %s1648_s30, 4   ;;  %s2109_s24 = smov %s1557_s25 }
0x130b   : > { %s2110_s25 = smov %s1561_s26  ;;  %s2111_s26 = smov %s1659_s10 }
0x130c   : > { %s2112_s27 = smov %s1648_s30  ;;  %19 = sbr.rel (!%p17_p9) target bundleno = 3 (0x3), region = 89 }
0x1311   :  { %1292 = vsyncpa [#allocation3], 1 }
0x1312   :  { %1294 = vsyncpa [#allocation3 + $0x1], 1 }

</bundles_post_ra>
